<compile_context>
chip_gen: v6e
topology: v6e:2x2x1
jax: 0.10.0
libtpu: 0.0.40
codegen_flags: <defaults>
</compile_context>

<pallas_src>
import functools

import jax
import jax.numpy as jnp
import numpy as np
from jax.experimental import pallas as pl
from jax.experimental.pallas import tpu as pltpu

NUM_ROUTING_ITERATIONS = 3


# ----------------------------------------------------------------------------
# Kernel
# ----------------------------------------------------------------------------
def _capsule_routing_kernel(x_ref, w_ref, e_ref, et_ref, out_ref, *,
                            batch_tile, num_capsules, out_channels,
                            num_iterations):
    TB, C, D = batch_tile, num_capsules, out_channels
    CD = C * D
    N = TB * CD                      # lane width of the hot arrays
    K = TB * C                       # per-capsule (narrow) lane width
    num_in = x_ref.shape[0]          # in_channels (contraction dim)
    R = x_ref.shape[1]               # route nodes

    E = e_ref[...]                   # (K, N)  0/1 capsule-indicator matrix
    Et = et_ref[...]                 # (N, K)

    # ---- priors[r, b*CD + c*D + d] = sum_i x[b,r,i] * W[c,r,i,d] ------------
    # x arrives pre-expanded to (num_in, R, N); weights are un-replicated
    # (num_in, R, CD) and widened across the TB batch segments once, outside the
    # routing loop, so the contraction below is pure lane-dense VPU FMA.
    w = [w_ref[i].astype(jnp.float32) for i in range(num_in)]       # (R, CD) each
    if N != CD:
        w = [jnp.concatenate([wi] * TB, axis=-1) for wi in w]       # (R, N) each
    priors = x_ref[0].astype(jnp.float32) * w[0]
    for i in range(1, num_in):                                      # static unroll
        priors = priors + x_ref[i].astype(jnp.float32) * w[i]
    # priors: (R, N) float32

    # logits kept at per-capsule width (torch logits are constant along D, so
    # the narrow softmax over route nodes is mathematically exact).
    logits = jnp.zeros((R, K), dtype=jnp.float32)
    outputs = None

    for it in range(num_iterations):                                # static unroll (3)
        # softmax over route nodes R (sublane axis) at narrow width.
        m = jnp.max(logits, axis=0, keepdims=True)                  # (1, K)
        ex = jnp.exp(logits - m)                                    # (R, K)
        probs_n = ex * pl.reciprocal(jnp.sum(ex, axis=0, keepdims=True),
                                     approx=True)                   # (R, K)
        # widen each capsule's prob across its D lanes on the MXU.
        probs = jnp.dot(probs_n, E, preferred_element_type=jnp.float32)   # (R, N)

        s = jnp.sum(probs * priors, axis=0, keepdims=True)                # (1, N)

        # squash: per-capsule squared norm via block-indicator matmuls (MXU).
        sq_n = jnp.dot(s * s, Et, preferred_element_type=jnp.float32)     # (1, K)
        sq = jnp.dot(sq_n, E, preferred_element_type=jnp.float32)         # (1, N)
        # scale*s/sqrt(sq) == s*sqrt(sq)/(1+sq); returns 0 for a zero-norm
        # capsule where the torch formula divides 0/0 (documented divergence).
        if it != num_iterations - 1:
            outputs = s * jnp.sqrt(sq) * pl.reciprocal(1.0 + sq, approx=True)
            # delta_logits[r, b*C+c] = sum_d priors*outputs (narrow MXU reduce;
            # no broadcast back to D lanes since logits stay narrow).
            logits = logits + jnp.dot(priors * outputs, Et,
                                      preferred_element_type=jnp.float32)  # (R, K)
        else:
            # exact reciprocal on the final squash (this value is the output).
            outputs = s * jnp.sqrt(sq) / (1.0 + sq)

    out_ref[...] = outputs.astype(out_ref.dtype)                    # (1, N) lane-dense


# ----------------------------------------------------------------------------
# Wrapper-side helpers
# ----------------------------------------------------------------------------
def prepare_route_weights(route_weights):
    """(C, R, I, D) -> (I, R, C*D).  TB-independent; precompute once and cache
    for static parameters (hoisted out of the per-call path)."""
    C, R, I, D = route_weights.shape
    return jnp.transpose(route_weights, (2, 1, 0, 3)).reshape(I, R, C * D)


def _physical_vmem_bytes():
    try:
        return int(pltpu.get_tpu_info().vmem_capacity_bytes)
    except Exception:
        return 64 * 1024 * 1024          # conservative fallback (v7x per-core VMEM)


def _num_tensorcores_per_chip():
    try:
        kind = jax.devices()[0].device_kind.lower()
    except Exception:
        return 1
    return 2 if ("v7" in kind or "7x" in kind) else 1


def _per_step_vmem_bytes(tb, C, D, R, num_in):
    CD = C * D
    n = tb * CD
    x_blk = 2 * num_in * R * n * 4          # double-buffered x block
    w_blk = 2 * num_in * R * CD * 4         # weight block (constant index_map)
    w_wide = num_in * R * n * 4             # in-kernel widened weights
    hot = 6 * R * n * 4                     # priors / probs / products / ...
    small = 3 * (tb * C) * n * 4 + 8 * n * 4
    return x_blk + w_blk + w_wide + hot + small


def _choose_batch_tile(B, C, D, R, num_in, num_tc, vmem_budget_bytes):
    CD = C * D
    divisors = [d for d in range(1, B + 1) if B % d == 0]
    fitting = [d for d in divisors
               if _per_step_vmem_bytes(d, C, D, R, num_in) <= vmem_budget_bytes]
    if not fitting:
        fitting = [1]
    # prefer lane-dense tiles (tile lane width a multiple of the 128-lane vreg)
    dense = [d for d in fitting if (d * CD) % 128 == 0]
    pool = dense if dense else fitting
    tb = max(pool)                           # single-TC chips: biggest fused tile
    if num_tc >= 2:
        multi = [d for d in pool if (B // d) >= num_tc]
        if multi:
            tb = max(multi)                  # >= num_tc parallel steps for megacore
    return tb


# ----------------------------------------------------------------------------
# Forward
# ----------------------------------------------------------------------------
def capsule_layer_forward(x, route_weights, *, prepared_weights=None,
                          num_iterations=NUM_ROUTING_ITERATIONS):
    """x: (B, R, I) float32; route_weights: (C, R, I, D) float32.

    Returns (C, B, 1, 1, D), matching the PyTorch routing-branch output shape.
    """
    B, R, I = x.shape
    C, R2, I2, D = route_weights.shape
    assert (R, I) == (R2, I2)
    CD = C * D

    phys_vmem = _physical_vmem_bytes()
    num_tc = _num_tensorcores_per_chip()
    TB = _choose_batch_tile(B, C, D, R, I, num_tc, int(phys_vmem * 0.6))
    num_tiles = B // TB
    N = TB * CD                       # per-step lane width (>=128 when possible)
    K = TB * C

    # --- wrapper-side layout plumbing (cheap XLA reshapes) -------------------
    w2 = prepare_route_weights(route_weights) if prepared_weights is None \
        else prepared_weights                                          # (I, R, CD)
    # x expanded to the packed lane layout: x_exp[i, r, b*CD + c*D + d] = x[b,r,i]
    x_exp = jnp.broadcast_to(
        jnp.transpose(x, (2, 1, 0))[:, :, :, None], (I, R, B, CD)
    ).reshape(I, R, B * CD)
    # capsule indicator for the per-tile lane layout: E[k, n] = (n // D == k)
    lane_caps = np.arange(N) // D                       # = b_local*C + c
    E_np = (lane_caps[None, :] == np.arange(K)[:, None]).astype(np.float32)
    E = jnp.asarray(E_np)                               # (K, N)
    Et = jnp.asarray(E_np.T)                            # (N, K)

    step_bytes = _per_step_vmem_bytes(TB, C, D, R, I)
    vmem_limit = int(min(phys_vmem * 3 // 4,
                         max(32 * 1024 * 1024, 4 * step_bytes)))

    kernel = functools.partial(
        _capsule_routing_kernel, batch_tile=TB, num_capsules=C,
        out_channels=D, num_iterations=num_iterations)

    out = pl.pallas_call(
        kernel,
        out_shape=jax.ShapeDtypeStruct((num_tiles, N), jnp.float32),
        grid=(num_tiles,),
        in_specs=[
            # pre-expanded x: one lane-dense batch tile per step.
            pl.BlockSpec((I, R, N), lambda t: (0, 0, t)),
            # weights: identical full block every step -> Pallas skips re-DMA.
            pl.BlockSpec((I, R, CD), lambda t: (0, 0, 0)),
            pl.BlockSpec((K, N), lambda t: (0, 0)),
            pl.BlockSpec((N, K), lambda t: (0, 0)),
        ],
        # lane-dense output slab per step -> unmasked vst.
        out_specs=pl.BlockSpec((1, N), lambda t: (t, 0)),
        compiler_params=pltpu.CompilerParams(
            dimension_semantics=("parallel",),
            vmem_limit_bytes=vmem_limit,
        ),
    )(x_exp, w2, E, Et)

    # (num_tiles, TB*C*D) -> (B, C, D) -> (C, B, 1, 1, D)
    out = jnp.transpose(out.reshape(B, C, D), (1, 0, 2))
    return out[:, :, None, None, :]


# ----------------------------------------------------------------------------
# Pure-JAX reference (replica of the torch forward) and test harness
# ----------------------------------------------------------------------------
def capsule_layer_reference(x, route_weights):
    priors = jnp.einsum("bri,crid->cbrd", x, route_weights)[:, :, :, None, :]
    logits = jnp.zeros_like(priors)
    outputs = None
    for i in range(NUM_ROUTING_ITERATIONS):
        probs = jax.nn.softmax(logits, axis=2)
        s = jnp.sum(probs * priors, axis=2, keepdims=True)
        sq = jnp.sum(s * s, axis=-1, keepdims=True)
        outputs = (sq / (1.0 + sq)) * s / jnp.sqrt(sq)
        if i != NUM_ROUTING_ITERATIONS - 1:
            logits = logits + jnp.sum(priors * outputs, axis=-1, keepdims=True)
    return outputs  # (C, B, 1, 1, D)


if __name__ == "__main__":
    key = jax.random.PRNGKey(0)
    kx, kw = jax.random.split(key)

    # Small, module-consistent shapes (B*C*D = 128 -> one full lane vreg):
    B, C, R, I, D = 2, 4, 64, 8, 16   # batch, num_capsules, route_nodes, in_ch, out_ch
    # NOTE: real tuning should be re-measured at representative CapsNet shapes
    # (R~1152, C=10, B>=32); this toy size is correctness-only.

    x = jax.random.normal(kx, (B, R, I), dtype=jnp.float32)
    # deterministic stand-in for nn.Parameter(torch.randn(C, R, I, D))
    route_weights = jax.random.normal(kw, (C, R, I, D), dtype=jnp.float32)

    prepared = prepare_route_weights(route_weights)   # hoisted weight layout prep
    out = capsule_layer_forward(x, route_weights, prepared_weights=prepared)
    out = jax.block_until_ready(out)

    ref = capsule_layer_reference(x, route_weights)
    assert out.shape == (C, B, 1, 1, D)
    # Tolerance covers the approximate EUP reciprocals in the routing iterations
    # and possible reduced-precision MXU passes on the tiny 0/1 indicator matmuls.
    np.testing.assert_allclose(np.asarray(out), np.asarray(ref),
                               rtol=2e-2, atol=2e-3)

    print("KERNEL_OK")
</pallas_src>

<mosaic_0001>
module attributes {stable_mosaic.version = 11 : i64} {
  func.func @_capsule_routing_kernel(%arg0: i32, %arg1: memref<8x64x128xf32, #tpu.memory_space<vmem>>, %arg2: memref<8x64x64xf32, #tpu.memory_space<vmem>>, %arg3: memref<8x128xf32, #tpu.memory_space<vmem>>, %arg4: memref<128x8xf32, #tpu.memory_space<vmem>>, %arg5: memref<1x128xf32, #tpu.memory_space<vmem>>) attributes {dimension_semantics = [#tpu.dimension_semantics<parallel>], iteration_bounds = array<i64: 1>, scalar_prefetch = 0 : i64, scratch_operands = 0 : i64, tpu.core_type = #tpu.core_type<tc>, window_params = [{transform_indices = @transform_0, window_bounds = array<i64: 8, 64, 128>}, {pipeline_mode = #tpu.pipeline_mode<synchronous>, transform_indices = @transform_1, window_bounds = array<i64: 8, 64, 64>}, {pipeline_mode = #tpu.pipeline_mode<synchronous>, transform_indices = @transform_2, window_bounds = array<i64: 8, 128>}, {pipeline_mode = #tpu.pipeline_mode<synchronous>, transform_indices = @transform_3, window_bounds = array<i64: 128, 8>}, {transform_indices = @transform_4, window_bounds = array<i64: 1, 128>}]} {
    %c0 = arith.constant 0 : index
    %c0_0 = arith.constant 0 : index
    %0 = vector.load %arg3[%c0, %c0_0] : memref<8x128xf32, #tpu.memory_space<vmem>>, vector<8x128xf32>
    %c0_1 = arith.constant 0 : index
    %c0_2 = arith.constant 0 : index
    %1 = vector.load %arg4[%c0_1, %c0_2] : memref<128x8xf32, #tpu.memory_space<vmem>>, vector<128x8xf32>
    %c0_3 = arith.constant 0 : index
    %c0_4 = arith.constant 0 : index
    %c0_5 = arith.constant 0 : index
    %2 = vector.load %arg2[%c0_3, %c0_4, %c0_5] : memref<8x64x64xf32, #tpu.memory_space<vmem>>, vector<1x64x64xf32>
    %3 = vector.shape_cast %2 : vector<1x64x64xf32> to vector<64x64xf32>
    %c1 = arith.constant 1 : index
    %c0_6 = arith.constant 0 : index
    %c0_7 = arith.constant 0 : index
    %4 = vector.load %arg2[%c1, %c0_6, %c0_7] : memref<8x64x64xf32, #tpu.memory_space<vmem>>, vector<1x64x64xf32>
    %5 = vector.shape_cast %4 : vector<1x64x64xf32> to vector<64x64xf32>
    %c2 = arith.constant 2 : index
    %c0_8 = arith.constant 0 : index
    %c0_9 = arith.constant 0 : index
    %6 = vector.load %arg2[%c2, %c0_8, %c0_9] : memref<8x64x64xf32, #tpu.memory_space<vmem>>, vector<1x64x64xf32>
    %7 = vector.shape_cast %6 : vector<1x64x64xf32> to vector<64x64xf32>
    %c3 = arith.constant 3 : index
    %c0_10 = arith.constant 0 : index
    %c0_11 = arith.constant 0 : index
    %8 = vector.load %arg2[%c3, %c0_10, %c0_11] : memref<8x64x64xf32, #tpu.memory_space<vmem>>, vector<1x64x64xf32>
    %9 = vector.shape_cast %8 : vector<1x64x64xf32> to vector<64x64xf32>
    %c4 = arith.constant 4 : index
    %c0_12 = arith.constant 0 : index
    %c0_13 = arith.constant 0 : index
    %10 = vector.load %arg2[%c4, %c0_12, %c0_13] : memref<8x64x64xf32, #tpu.memory_space<vmem>>, vector<1x64x64xf32>
    %11 = vector.shape_cast %10 : vector<1x64x64xf32> to vector<64x64xf32>
    %c5 = arith.constant 5 : index
    %c0_14 = arith.constant 0 : index
    %c0_15 = arith.constant 0 : index
    %12 = vector.load %arg2[%c5, %c0_14, %c0_15] : memref<8x64x64xf32, #tpu.memory_space<vmem>>, vector<1x64x64xf32>
    %13 = vector.shape_cast %12 : vector<1x64x64xf32> to vector<64x64xf32>
    %c6 = arith.constant 6 : index
    %c0_16 = arith.constant 0 : index
    %c0_17 = arith.constant 0 : index
    %14 = vector.load %arg2[%c6, %c0_16, %c0_17] : memref<8x64x64xf32, #tpu.memory_space<vmem>>, vector<1x64x64xf32>
    %15 = vector.shape_cast %14 : vector<1x64x64xf32> to vector<64x64xf32>
    %c7 = arith.constant 7 : index
    %c0_18 = arith.constant 0 : index
    %c0_19 = arith.constant 0 : index
    %16 = vector.load %arg2[%c7, %c0_18, %c0_19] : memref<8x64x64xf32, #tpu.memory_space<vmem>>, vector<1x64x64xf32>
    %17 = vector.shape_cast %16 : vector<1x64x64xf32> to vector<64x64xf32>
    %18 = tpu.concatenate %3, %3 in 1 : vector<64x64xf32>, vector<64x64xf32> -> vector<64x128xf32>
    %19 = tpu.concatenate %5, %5 in 1 : vector<64x64xf32>, vector<64x64xf32> -> vector<64x128xf32>
    %20 = tpu.concatenate %7, %7 in 1 : vector<64x64xf32>, vector<64x64xf32> -> vector<64x128xf32>
    %21 = tpu.concatenate %9, %9 in 1 : vector<64x64xf32>, vector<64x64xf32> -> vector<64x128xf32>
    %22 = tpu.concatenate %11, %11 in 1 : vector<64x64xf32>, vector<64x64xf32> -> vector<64x128xf32>
    %23 = tpu.concatenate %13, %13 in 1 : vector<64x64xf32>, vector<64x64xf32> -> vector<64x128xf32>
    %24 = tpu.concatenate %15, %15 in 1 : vector<64x64xf32>, vector<64x64xf32> -> vector<64x128xf32>
    %25 = tpu.concatenate %17, %17 in 1 : vector<64x64xf32>, vector<64x64xf32> -> vector<64x128xf32>
    %c0_20 = arith.constant 0 : index
    %c0_21 = arith.constant 0 : index
    %c0_22 = arith.constant 0 : index
    %26 = vector.load %arg1[%c0_20, %c0_21, %c0_22] : memref<8x64x128xf32, #tpu.memory_space<vmem>>, vector<1x64x128xf32>
    %27 = vector.shape_cast %26 : vector<1x64x128xf32> to vector<64x128xf32>
    %28 = arith.mulf %27, %18 : vector<64x128xf32>
    %c1_23 = arith.constant 1 : index
    %c0_24 = arith.constant 0 : index
    %c0_25 = arith.constant 0 : index
    %29 = vector.load %arg1[%c1_23, %c0_24, %c0_25] : memref<8x64x128xf32, #tpu.memory_space<vmem>>, vector<1x64x128xf32>
    %30 = vector.shape_cast %29 : vector<1x64x128xf32> to vector<64x128xf32>
    %31 = arith.mulf %30, %19 : vector<64x128xf32>
    %32 = arith.addf %28, %31 : vector<64x128xf32>
    %c2_26 = arith.constant 2 : index
    %c0_27 = arith.constant 0 : index
    %c0_28 = arith.constant 0 : index
    %33 = vector.load %arg1[%c2_26, %c0_27, %c0_28] : memref<8x64x128xf32, #tpu.memory_space<vmem>>, vector<1x64x128xf32>
    %34 = vector.shape_cast %33 : vector<1x64x128xf32> to vector<64x128xf32>
    %35 = arith.mulf %34, %20 : vector<64x128xf32>
    %36 = arith.addf %32, %35 : vector<64x128xf32>
    %c3_29 = arith.constant 3 : index
    %c0_30 = arith.constant 0 : index
    %c0_31 = arith.constant 0 : index
    %37 = vector.load %arg1[%c3_29, %c0_30, %c0_31] : memref<8x64x128xf32, #tpu.memory_space<vmem>>, vector<1x64x128xf32>
    %38 = vector.shape_cast %37 : vector<1x64x128xf32> to vector<64x128xf32>
    %39 = arith.mulf %38, %21 : vector<64x128xf32>
    %40 = arith.addf %36, %39 : vector<64x128xf32>
    %c4_32 = arith.constant 4 : index
    %c0_33 = arith.constant 0 : index
    %c0_34 = arith.constant 0 : index
    %41 = vector.load %arg1[%c4_32, %c0_33, %c0_34] : memref<8x64x128xf32, #tpu.memory_space<vmem>>, vector<1x64x128xf32>
    %42 = vector.shape_cast %41 : vector<1x64x128xf32> to vector<64x128xf32>
    %43 = arith.mulf %42, %22 : vector<64x128xf32>
    %44 = arith.addf %40, %43 : vector<64x128xf32>
    %c5_35 = arith.constant 5 : index
    %c0_36 = arith.constant 0 : index
    %c0_37 = arith.constant 0 : index
    %45 = vector.load %arg1[%c5_35, %c0_36, %c0_37] : memref<8x64x128xf32, #tpu.memory_space<vmem>>, vector<1x64x128xf32>
    %46 = vector.shape_cast %45 : vector<1x64x128xf32> to vector<64x128xf32>
    %47 = arith.mulf %46, %23 : vector<64x128xf32>
    %48 = arith.addf %44, %47 : vector<64x128xf32>
    %c6_38 = arith.constant 6 : index
    %c0_39 = arith.constant 0 : index
    %c0_40 = arith.constant 0 : index
    %49 = vector.load %arg1[%c6_38, %c0_39, %c0_40] : memref<8x64x128xf32, #tpu.memory_space<vmem>>, vector<1x64x128xf32>
    %50 = vector.shape_cast %49 : vector<1x64x128xf32> to vector<64x128xf32>
    %51 = arith.mulf %50, %24 : vector<64x128xf32>
    %52 = arith.addf %48, %51 : vector<64x128xf32>
    %c7_41 = arith.constant 7 : index
    %c0_42 = arith.constant 0 : index
    %c0_43 = arith.constant 0 : index
    %53 = vector.load %arg1[%c7_41, %c0_42, %c0_43] : memref<8x64x128xf32, #tpu.memory_space<vmem>>, vector<1x64x128xf32>
    %54 = vector.shape_cast %53 : vector<1x64x128xf32> to vector<64x128xf32>
    %55 = arith.mulf %54, %25 : vector<64x128xf32>
    %56 = arith.addf %52, %55 : vector<64x128xf32>
    %cst = arith.constant 0.000000e+00 : f32
    %57 = vector.broadcast %cst : f32 to vector<64x8xf32>
    %cst_44 = arith.constant dense<0xFF800000> : vector<8xf32>
    %58 = vector.multi_reduction <maximumf>, %57, %cst_44 [0] : vector<64x8xf32> to vector<8xf32>
    %59 = vector.shape_cast %58 : vector<8xf32> to vector<1x8xf32>
    %60 = vector.broadcast %59 : vector<1x8xf32> to vector<64x8xf32>
    %61 = arith.subf %57, %60 : vector<64x8xf32>
    %62 = math.exp %61 : vector<64x8xf32>
    %cst_45 = arith.constant dense<0.000000e+00> : vector<8xf32>
    %63 = vector.multi_reduction <add>, %62, %cst_45 [0] : vector<64x8xf32> to vector<8xf32>
    %64 = vector.shape_cast %63 : vector<8xf32> to vector<1x8xf32>
    %65 = tpu.reciprocal %64 {approx = true} : vector<1x8xf32> -> vector<1x8xf32>
    %66 = vector.broadcast %65 : vector<1x8xf32> to vector<64x8xf32>
    %67 = arith.mulf %62, %66 : vector<64x8xf32>
    %cst_46 = arith.constant dense<0.000000e+00> : vector<64x128xf32>
    %68 = tpu.matmul %67, %0, %cst_46 {dimension_numbers = #tpu.dot_dimension_numbers<[1], [0], [0], [1], [0, 0, 1, 1], [], []>} : vector<64x8xf32>, vector<8x128xf32>, vector<64x128xf32> -> vector<64x128xf32>
    %69 = arith.mulf %68, %56 : vector<64x128xf32>
    %cst_47 = arith.constant dense<0.000000e+00> : vector<128xf32>
    %70 = vector.multi_reduction <add>, %69, %cst_47 [0] : vector<64x128xf32> to vector<128xf32>
    %71 = vector.shape_cast %70 : vector<128xf32> to vector<1x128xf32>
    %72 = arith.mulf %71, %71 : vector<1x128xf32>
    %cst_48 = arith.constant dense<0.000000e+00> : vector<1x8xf32>
    %73 = tpu.matmul %72, %1, %cst_48 {dimension_numbers = #tpu.dot_dimension_numbers<[1], [0], [0], [1], [0, 0, 1, 1], [], []>} : vector<1x128xf32>, vector<128x8xf32>, vector<1x8xf32> -> vector<1x8xf32>
    %cst_49 = arith.constant dense<0.000000e+00> : vector<1x128xf32>
    %74 = tpu.matmul %73, %0, %cst_49 {dimension_numbers = #tpu.dot_dimension_numbers<[1], [0], [0], [1], [0, 0, 1, 1], [], []>} : vector<1x8xf32>, vector<8x128xf32>, vector<1x128xf32> -> vector<1x128xf32>
    %75 = math.sqrt %74 : vector<1x128xf32>
    %76 = arith.mulf %71, %75 : vector<1x128xf32>
    %cst_50 = arith.constant 1.000000e+00 : f32
    %77 = vector.broadcast %cst_50 : f32 to vector<1x128xf32>
    %78 = arith.addf %77, %74 : vector<1x128xf32>
    %79 = tpu.reciprocal %78 {approx = true} : vector<1x128xf32> -> vector<1x128xf32>
    %80 = arith.mulf %76, %79 : vector<1x128xf32>
    %81 = vector.broadcast %80 : vector<1x128xf32> to vector<64x128xf32>
    %82 = arith.mulf %56, %81 : vector<64x128xf32>
    %cst_51 = arith.constant dense<0.000000e+00> : vector<64x8xf32>
    %83 = tpu.matmul %82, %1, %cst_51 {dimension_numbers = #tpu.dot_dimension_numbers<[1], [0], [0], [1], [0, 0, 1, 1], [], []>} : vector<64x128xf32>, vector<128x8xf32>, vector<64x8xf32> -> vector<64x8xf32>
    %84 = arith.addf %57, %83 : vector<64x8xf32>
    %cst_52 = arith.constant dense<0xFF800000> : vector<8xf32>
    %85 = vector.multi_reduction <maximumf>, %84, %cst_52 [0] : vector<64x8xf32> to vector<8xf32>
    %86 = vector.shape_cast %85 : vector<8xf32> to vector<1x8xf32>
    %87 = vector.broadcast %86 : vector<1x8xf32> to vector<64x8xf32>
    %88 = arith.subf %84, %87 : vector<64x8xf32>
    %89 = math.exp %88 : vector<64x8xf32>
    %cst_53 = arith.constant dense<0.000000e+00> : vector<8xf32>
    %90 = vector.multi_reduction <add>, %89, %cst_53 [0] : vector<64x8xf32> to vector<8xf32>
    %91 = vector.shape_cast %90 : vector<8xf32> to vector<1x8xf32>
    %92 = tpu.reciprocal %91 {approx = true} : vector<1x8xf32> -> vector<1x8xf32>
    %93 = vector.broadcast %92 : vector<1x8xf32> to vector<64x8xf32>
    %94 = arith.mulf %89, %93 : vector<64x8xf32>
    %cst_54 = arith.constant dense<0.000000e+00> : vector<64x128xf32>
    %95 = tpu.matmul %94, %0, %cst_54 {dimension_numbers = #tpu.dot_dimension_numbers<[1], [0], [0], [1], [0, 0, 1, 1], [], []>} : vector<64x8xf32>, vector<8x128xf32>, vector<64x128xf32> -> vector<64x128xf32>
    %96 = arith.mulf %95, %56 : vector<64x128xf32>
    %cst_55 = arith.constant dense<0.000000e+00> : vector<128xf32>
    %97 = vector.multi_reduction <add>, %96, %cst_55 [0] : vector<64x128xf32> to vector<128xf32>
    %98 = vector.shape_cast %97 : vector<128xf32> to vector<1x128xf32>
    %99 = arith.mulf %98, %98 : vector<1x128xf32>
    %cst_56 = arith.constant dense<0.000000e+00> : vector<1x8xf32>
    %100 = tpu.matmul %99, %1, %cst_56 {dimension_numbers = #tpu.dot_dimension_numbers<[1], [0], [0], [1], [0, 0, 1, 1], [], []>} : vector<1x128xf32>, vector<128x8xf32>, vector<1x8xf32> -> vector<1x8xf32>
    %cst_57 = arith.constant dense<0.000000e+00> : vector<1x128xf32>
    %101 = tpu.matmul %100, %0, %cst_57 {dimension_numbers = #tpu.dot_dimension_numbers<[1], [0], [0], [1], [0, 0, 1, 1], [], []>} : vector<1x8xf32>, vector<8x128xf32>, vector<1x128xf32> -> vector<1x128xf32>
    %102 = math.sqrt %101 : vector<1x128xf32>
    %103 = arith.mulf %98, %102 : vector<1x128xf32>
    %cst_58 = arith.constant 1.000000e+00 : f32
    %104 = vector.broadcast %cst_58 : f32 to vector<1x128xf32>
    %105 = arith.addf %104, %101 : vector<1x128xf32>
    %106 = tpu.reciprocal %105 {approx = true} : vector<1x128xf32> -> vector<1x128xf32>
    %107 = arith.mulf %103, %106 : vector<1x128xf32>
    %108 = vector.broadcast %107 : vector<1x128xf32> to vector<64x128xf32>
    %109 = arith.mulf %56, %108 : vector<64x128xf32>
    %cst_59 = arith.constant dense<0.000000e+00> : vector<64x8xf32>
    %110 = tpu.matmul %109, %1, %cst_59 {dimension_numbers = #tpu.dot_dimension_numbers<[1], [0], [0], [1], [0, 0, 1, 1], [], []>} : vector<64x128xf32>, vector<128x8xf32>, vector<64x8xf32> -> vector<64x8xf32>
    %111 = arith.addf %84, %110 : vector<64x8xf32>
    %cst_60 = arith.constant dense<0xFF800000> : vector<8xf32>
    %112 = vector.multi_reduction <maximumf>, %111, %cst_60 [0] : vector<64x8xf32> to vector<8xf32>
    %113 = vector.shape_cast %112 : vector<8xf32> to vector<1x8xf32>
    %114 = vector.broadcast %113 : vector<1x8xf32> to vector<64x8xf32>
    %115 = arith.subf %111, %114 : vector<64x8xf32>
    %116 = math.exp %115 : vector<64x8xf32>
    %cst_61 = arith.constant dense<0.000000e+00> : vector<8xf32>
    %117 = vector.multi_reduction <add>, %116, %cst_61 [0] : vector<64x8xf32> to vector<8xf32>
    %118 = vector.shape_cast %117 : vector<8xf32> to vector<1x8xf32>
    %119 = tpu.reciprocal %118 {approx = true} : vector<1x8xf32> -> vector<1x8xf32>
    %120 = vector.broadcast %119 : vector<1x8xf32> to vector<64x8xf32>
    %121 = arith.mulf %116, %120 : vector<64x8xf32>
    %cst_62 = arith.constant dense<0.000000e+00> : vector<64x128xf32>
    %122 = tpu.matmul %121, %0, %cst_62 {dimension_numbers = #tpu.dot_dimension_numbers<[1], [0], [0], [1], [0, 0, 1, 1], [], []>} : vector<64x8xf32>, vector<8x128xf32>, vector<64x128xf32> -> vector<64x128xf32>
    %123 = arith.mulf %122, %56 : vector<64x128xf32>
    %cst_63 = arith.constant dense<0.000000e+00> : vector<128xf32>
    %124 = vector.multi_reduction <add>, %123, %cst_63 [0] : vector<64x128xf32> to vector<128xf32>
    %125 = vector.shape_cast %124 : vector<128xf32> to vector<1x128xf32>
    %126 = arith.mulf %125, %125 : vector<1x128xf32>
    %cst_64 = arith.constant dense<0.000000e+00> : vector<1x8xf32>
    %127 = tpu.matmul %126, %1, %cst_64 {dimension_numbers = #tpu.dot_dimension_numbers<[1], [0], [0], [1], [0, 0, 1, 1], [], []>} : vector<1x128xf32>, vector<128x8xf32>, vector<1x8xf32> -> vector<1x8xf32>
    %cst_65 = arith.constant dense<0.000000e+00> : vector<1x128xf32>
    %128 = tpu.matmul %127, %0, %cst_65 {dimension_numbers = #tpu.dot_dimension_numbers<[1], [0], [0], [1], [0, 0, 1, 1], [], []>} : vector<1x8xf32>, vector<8x128xf32>, vector<1x128xf32> -> vector<1x128xf32>
    %129 = math.sqrt %128 : vector<1x128xf32>
    %130 = arith.mulf %125, %129 : vector<1x128xf32>
    %cst_66 = arith.constant 1.000000e+00 : f32
    %131 = vector.broadcast %cst_66 : f32 to vector<1x128xf32>
    %132 = arith.addf %131, %128 : vector<1x128xf32>
    %133 = arith.divf %130, %132 : vector<1x128xf32>
    %c0_67 = arith.constant 0 : index
    %c0_68 = arith.constant 0 : index
    %134 = vector.load %arg5[%c0_67, %c0_68] : memref<1x128xf32, #tpu.memory_space<vmem>>, vector<1x128xf32>
    tpu.vector_store %arg5[%c0_67, %c0_68], %133 {strides = array<i32>} : memref<1x128xf32, #tpu.memory_space<vmem>>, vector<1x128xf32>,
    return
  }
  func.func @transform_0(%arg0: i32) -> (i32, i32, i32) {
    %c0_i32 = arith.constant 0 : i32
    %c0_i32_0 = arith.constant 0 : i32
    %c0_i32_1 = arith.constant 0 : i32
    return %c0_i32, %c0_i32_0, %arg0 : i32, i32, i32
  }
  func.func @transform_1(%arg0: i32) -> (i32, i32, i32) {
    %c0_i32 = arith.constant 0 : i32
    %c0_i32_0 = arith.constant 0 : i32
    %c0_i32_1 = arith.constant 0 : i32
    %c0_i32_2 = arith.constant 0 : i32
    return %c0_i32, %c0_i32_0, %c0_i32_1 : i32, i32, i32
  }
  func.func @transform_2(%arg0: i32) -> (i32, i32) {
    %c0_i32 = arith.constant 0 : i32
    %c0_i32_0 = arith.constant 0 : i32
    %c0_i32_1 = arith.constant 0 : i32
    return %c0_i32, %c0_i32_0 : i32, i32
  }
  func.func @transform_3(%arg0: i32) -> (i32, i32) {
    %c0_i32 = arith.constant 0 : i32
    %c0_i32_0 = arith.constant 0 : i32
    %c0_i32_1 = arith.constant 0 : i32
    return %c0_i32, %c0_i32_0 : i32, i32
  }
  func.func @transform_4(%arg0: i32) -> (i32, i32) {
    %c0_i32 = arith.constant 0 : i32
    %c0_i32_0 = arith.constant 0 : i32
    return %arg0, %c0_i32 : i32, i32
  }
}

</mosaic_0001>

<bundles_post_ra>
// kernel: tpu_custom_call.1
= control target key start
LH: loop header
LB: loop body
LE: loop exit
PB: predicated region body
PF: predicated region fallthrough
CT: control target
= control target key end

     0   :  { %9 = vsyncpa [#allocation3], 0  ;;  %s3497_s0 = inlined_call_operand.hbm [shape: f32[8,64,128], index: 0, kind: input, shape index: {}]   ;;  %s3498_s1 = inlined_call_operand.hbm [shape: f32[8,64,64], index: 1, kind: input, shape index: {}]   ;;  %s3499_s2 = inlined_call_operand.vmem [shape: f32[8,128], index: 2, kind: input, shape index: {}]   ;;  %s3500_s3 = inlined_call_operand.vmem [shape: f32[128,8], index: 3, kind: input, shape index: {}]   ;;  %s3501_s4 = inlined_call_operand.hbm [shape: f32[1,128], index: 4, kind: output, shape index: {}]  }
   0x1   :  { %10 = vsyncpa [#allocation6], 0 }
   0x2   :  { %11 = vsyncpa [#allocation4], 0  ;;  %s2500_s15 = smov [#allocation2]  }
   0x3   :  { %s17_s16 = sshll.u32 %s2500_s15, 4  ;;  %s18_s16 = int_to_ptr.vmem [resolvable:$true] %s17_s16 }
   0x4   :  { %s2442_s17 = scalar_lea.vmem %s18_s16, 8192  ;;  %p2447_p1 = scmp.lt.s32.totalorder %s18_s16, %s18_s16 }
   0x5   :  { %p2443_p0 = scmp.ne.s32.totalorder %s18_s16, %s2442_s17  ;;  %p2448_p2 = scmp.lt.s32.totalorder %s2442_s17, %s2442_s17 }
   0x7   :  { %p2449_p3 = por %p2448_p2, %p2447_p1 }
   0x9   :  { %p2450_p4 = pnand %p2449_p3, %p2443_p0 }
   0xb   :  { %2453 = shalt.err (!%p2450_p4)
}
   0xc   :  { %s2501_s18 = smov 128   ;;  %s2502_s19 = smov 8  }
   0xd   :  { %23 = dma.hbm_to_vmem [thread:$0]  %s3497_s0, 8192, %s18_s16, [#allocation3], %s2501_s18, %s2501_s18, %s2502_s19  }
   0xe   :  { %s2503_s22 = smov [#allocation5]  }
   0xf   :  { %s29_s23 = sshll.u32 %s2503_s22, 4  ;;  %s30_s23 = int_to_ptr.vmem [resolvable:$true] %s29_s23 }
  0x10   :  { %s2462_s24 = scalar_lea.vmem %s30_s23, 8192  ;;  %p2467_p6 = scmp.lt.s32.totalorder %s30_s23, %s30_s23 }
  0x11   :  { %p2463_p5 = scmp.ne.s32.totalorder %s30_s23, %s2462_s24  ;;  %p2468_p7 = scmp.lt.s32.totalorder %s2462_s24, %s2462_s24 }
  0x13   :  { %p2469_p8 = por %p2468_p7, %p2467_p6 }
  0x15   :  { %p2470_p9 = pnand %p2469_p8, %p2463_p5 }
  0x17   :  { %2473 = shalt.err (!%p2470_p9)
}
  0x18   :  { %35 = dma.hbm_to_vmem [thread:$0]  %s3498_s1, 8192, %s30_s23, [#allocation6], %s2501_s18, %s2501_s18, %s2502_s19  }
  0x19   :  { %2494 = dma.done.wait [#allocation3], 8192  }
  0x1a   :  { %2495 = vsyncadd [#allocation3], 4294959104 }
  0x1b   :  { %2496 = dma.done.wait [#allocation6], 8192  }
  0x1c   :  { %2497 = vsyncadd [#allocation6], 4294959104  ;;  %vm647_vm0 = vcmask 64512   ;;  %v2504_v0 = vmov 0.015625   ;;  %v2541_v1 = vld [vmem:[#allocation5 + $0x40] sm:$0xff]  ;;  %s2505_s28 = smov 64  }
  0x1d   :  { %2112 = vmatprep.mubr.msk.f32.mxu0 %vm647_vm0, %v2504_v0  ;;  %v2543_v2 = vld [vmem:[#allocation5] sm:$0xff]  ;;  %183 = vrot.lane.b32.xlu1 %v2541_v1, %s2505_s28  ;;  %v2555_v4 = vld [vmem:[#allocation5 + $0x48] sm:$0xff]  ;;  %v2565_v6 = vld [vmem:[#allocation5 + $0x50] sm:$0xff]  ;;  %v3534_v59 = vmov 0.0   ;;  %vm166_vm1 = vcmask 523264   ;;  %vm2507_vm2 = vmmov 0  }
  0x1e   :  { %v2548_v3 = vld [vmem:[%s3499_s2] sm:$0xff]  ;;  %142 = vrot.lane.b32.xlu0 %v2543_v2, %s2505_s28  ;;  %v2557_v5 = vld [vmem:[#allocation5 + $0x8] sm:$0xff]  ;;  %v2567_v7 = vld [vmem:[#allocation5 + $0x10] sm:$0xff]  ;;  %2124 = vmatprep.subr.mxu1 %v3534_v59 }
  0x1f   :  { %2110 = vmatprep.subr.mxu0 %v2548_v3  ;;  %v2575_v8 = vld [vmem:[#allocation5 + $0x88] sm:$0xff]  ;;  %v2577_v9 = vld [vmem:[#allocation5 + $0x80] sm:$0xff]  ;;  %v2585_v10 = vld [vmem:[#allocation5 + $0x58] sm:$0xff]  ;;  %2156 = vmatprep.mubr.msk.f32.mxu1 %vm2507_vm2, %v3534_v59 }
  0x20   :  { %2111 = vmatpush3.msra.mxu0 %v2548_v3  ;;  %v2587_v11 = vld [vmem:[#allocation5 + $0x18] sm:$0xff]  ;;  %v2595_v12 = vld [vmem:[#allocation5 + $0xc0] sm:$0xff]  ;;  %v2597_v13 = vld [vmem:[#allocation5 + $0x90] sm:$0xff] }
  0x21   :  { %2113 = vmatmul.mubr.msk.f32.vlgmr.msra.gmra.mxu0 %vm647_vm0, %v2504_v0  ;;  %185 = vrot.lane.b32.xlu1 %v2555_v4, %s2505_s28  ;;  %v2603_v14 = vld [vmem:[#allocation5 + $0x20] sm:$0xff]  ;;  %v2605_v15 = vld [vmem:[#allocation5 + $0xc8] sm:$0xff]  ;;  %v2611_v16 = vld [vmem:[#allocation5 + $0x98] sm:$0xff] }
  0x22   :  { %144 = vrot.lane.b32.xlu0 %v2557_v5, %s2505_s28  ;;  %2115 = vmatprep.mubr.msk.f32.mxu0 %vm647_vm0, %v2504_v0  ;;  %v2613_v17 = vld [vmem:[#allocation5 + $0x60] sm:$0xff]  ;;  %v2621_v19 = vld [vmem:[#allocation5 + $0xd0] sm:$0xff]  ;;  %v2627_v20 = vld [vmem:[#allocation5 + $0x28] sm:$0xff] }
  0x23   :  { %v2619_v18 = vld [vmem:[#allocation5 + $0x100] sm:$0xff]  ;;  %v2629_v21 = vld [vmem:[#allocation5 + $0x108] sm:$0xff]  ;;  %v2643_v24 = vld [vmem:[#allocation5 + $0x110] sm:$0xff]  ;;  %2159 = vmatprep.subr.mxu0 %v3534_v59 }
  0x24   :  { %v2635_v22 = vld [vmem:[#allocation5 + $0xa0] sm:$0xff]  ;;  %v2637_v23 = vld [vmem:[#allocation5 + $0x68] sm:$0xff]  ;;  %v2645_v25 = vld [vmem:[#allocation5 + $0xd8] sm:$0xff]  ;;  %2160 = vmatpush3.msra.mxu0 %v2548_v3 }
  0x25   :  { %2116 = vmatmul.mubr.msk.f32.gmra.mxu0 %vm647_vm0, %v2504_v0  ;;  %187 = vrot.lane.b32.xlu1 %v2565_v6, %s2505_s28  ;;  %v2651_v26 = vld [vmem:[#allocation5 + $0x148] sm:$0xff]  ;;  %v2653_v27 = vld [vmem:[#allocation5 + $0x140] sm:$0xff]  ;;  %v2659_v28 = vld [vmem:[#allocation5 + $0x70] sm:$0xff] }
  0x26   :  { %146 = vrot.lane.b32.xlu0 %v2567_v7, %s2505_s28  ;;  %2118 = vmatprep.mubr.msk.f32.mxu0 %vm647_vm0, %v2504_v0  ;;  %v2661_v29 = vld [vmem:[#allocation5 + $0x30] sm:$0xff]  ;;  %v2667_v30 = vld [vmem:[#allocation5 + $0xe0] sm:$0xff]  ;;  %v2669_v31 = vld [vmem:[#allocation5 + $0xa8] sm:$0xff] }
  0x27   :  { %v2675_v32 = vld [vmem:[#allocation5 + $0x150] sm:$0xff]  ;;  %v2677_v33 = vld [vmem:[#allocation5 + $0x118] sm:$0xff]  ;;  %v2683_v34 = vld [vmem:[#allocation5 + $0x188] sm:$0xff] }
  0x28   :  { %v2685_v35 = vld [vmem:[#allocation5 + $0x180] sm:$0xff]  ;;  %v2691_v36 = vld [vmem:[#allocation5 + $0x78] sm:$0xff]  ;;  %v2699_v38 = vld [vmem:[#allocation5 + $0xe8] sm:$0xff] }
  0x29   :  { %2119 = vmatmul.mubr.msk.f32.gmra.mxu0 %vm647_vm0, %v2504_v0  ;;  %225 = vrot.lane.b32.xlu1 %v2575_v8, %s2505_s28  ;;  %v2693_v37 = vld [vmem:[#allocation5 + $0x38] sm:$0xff]  ;;  %v2701_v39 = vld [vmem:[#allocation5 + $0xb0] sm:$0xff]  ;;  %v2709_v41 = vld [vmem:[#allocation5 + $0x120] sm:$0xff] }
  0x2a   :  { %223 = vrot.lane.b32.xlu0 %v2577_v9, %s2505_s28  ;;  %2121 = vmatprep.mubr.msk.f32.mxu0 %vm647_vm0, %v2504_v0  ;;  %v2707_v40 = vld [vmem:[#allocation5 + $0x158] sm:$0xff]  ;;  %v2715_v42 = vld [vmem:[#allocation5 + $0x1c0] sm:$0xff]  ;;  %v2717_v43 = vld [vmem:[#allocation5 + $0x190] sm:$0xff] }
  0x2b   :  { %v2723_v44 = vld [vmem:[#allocation5 + $0xb8] sm:$0xff]  ;;  %v2725_v45 = vld [vmem:[#allocation5 + $0x1c8] sm:$0xff]  ;;  %v2733_v47 = vld [vmem:[#allocation5 + $0xf0] sm:$0xff] }
  0x2c   :  { %v2731_v46 = vld [vmem:[#allocation5 + $0x128] sm:$0xff]  ;;  %3555 = vst [vmem:[#allocation12_spill] sm:$0xff] %v2733_v47  ;;  %v2739_v48 = vld [vmem:[#allocation5 + $0x198] sm:$0xff]  ;;  %v2741_v49 = vld [vmem:[#allocation5 + $0x160] sm:$0xff] }
  0x2d   :  { %2122 = vmatmul.mubr.msk.f32.gmra.mxu0 %vm647_vm0, %v2504_v0  ;;  %189 = vrot.lane.b32.xlu1 %v2585_v10, %s2505_s28  ;;  %3554 = vst [vmem:[#allocation11_spill] sm:$0xff] %v2731_v46  ;;  %v2747_v50 = vld [vmem:[#allocation5 + $0xf8] sm:$0xff]  ;;  %v2749_v51 = vld [vmem:[#allocation5 + $0x1d0] sm:$0xff]  ;;  %v2755_v52 = vld [vmem:[#allocation5 + $0x168] sm:$0xff] }
  0x2e   :  { %148 = vrot.lane.b32.xlu0 %v2587_v11, %s2505_s28  ;;  %3556 = vst [vmem:[#allocation13_spill] sm:$0xff] %v2747_v50  ;;  %3557 = vst [vmem:[#allocation14_spill] sm:$0xff] %v2749_v51  ;;  %v2757_v53 = vld [vmem:[#allocation5 + $0x130] sm:$0xff]  ;;  %v2763_v54 = vld [vmem:[#allocation5 + $0x1d8] sm:$0xff]  ;;  %2161 = vmatprep.mubr.msk.f32.mxu0 %vm2507_vm2, %v3534_v59 }
  0x2f   :  { %3558 = vst [vmem:[#allocation15_spill] sm:$0xff] %v2755_v52  ;;  %3559 = vst [vmem:[#allocation16_spill] sm:$0xff] %v2757_v53  ;;  %v2765_v55 = vld [vmem:[#allocation5 + $0x1a0] sm:$0xff]  ;;  %v2774_v56 = vld [vmem:[%s3500_s3 + $0x78] sm:$0xff] }
  0x30   :  { %3560 = vst [vmem:[#allocation17_spill] sm:$0xff] %v2763_v54  ;;  %3561 = vst [vmem:[#allocation18_spill] sm:$0xff] %v2765_v55  ;;  %v2776_v57 = vld [vmem:[#allocation5 + $0x170] sm:$0xff]  ;;  %v2778_v58 = vld [vmem:[#allocation5 + $0x138] sm:$0xff]  ;;  %2125 = vmatpush3.msra.mxu1 %v2774_v56  ;;  %2164 = vmatprep.subr.mxu0 %v2774_v56 }
  0x31   :  { %263 = vrot.lane.b32.xlu1 %v2595_v12, %s2505_s28  ;;  %3562 = vst [vmem:[#allocation19_spill] sm:$0xff] %v2774_v56  ;;  %3563 = vst [vmem:[#allocation20_spill] sm:$0xff] %v2776_v57  ;;  %v2786_v60 = vld [vmem:[%s3500_s3 + $0x70] sm:$0xff]  ;;  %2126 = vmatprep.subr.mxu1 %v3534_v59  ;;  %v2798_v61 = vld [vmem:[%s3500_s3 + $0x68] sm:$0xff] }
  0x32   :  { %227 = vrot.lane.b32.xlu0 %v2597_v13, %s2505_s28  ;;  %3564 = vst [vmem:[#allocation21_spill] sm:$0xff] %v2778_v58  ;;  %3565 = vst [vmem:[#allocation22_spill] sm:$0xff] %v2786_v60  ;;  %v2800_v62 = vld [vmem:[#allocation5 + $0x1e0] sm:$0xff]  ;;  %v2802_v63 = vld [vmem:[#allocation5 + $0x1a8] sm:$0xff]  ;;  %2127 = vmatpush3.msra.mxu1 %v2786_v60 }
  0x33   :  { %3566 = vst [vmem:[#allocation23_spill] sm:$0xff] %v2798_v61  ;;  %3567 = vst [vmem:[#allocation24_spill] sm:$0xff] %v2800_v62  ;;  %2128 = vmatprep.subr.mxu1 %v3534_v59  ;;  %v2810_v0 = vld [vmem:[%s3500_s3 + $0x60] sm:$0xff]  ;;  %v2818_v60 = vld [vmem:[#allocation5 + $0x178] sm:$0xff] }
  0x34   :  { %3568 = vst [vmem:[#allocation25_spill] sm:$0xff] %v2802_v63  ;;  %2129 = vmatpush3.msra.mxu1 %v2798_v61  ;;  %3569 = vst [vmem:[#allocation26_spill] sm:$0xff] %v2810_v0  ;;  %v472_v56 = vld [vmem:[#allocation2 + $0x40] sm:$0xff] }
  0x35   :  { %150 = vrot.lane.b32.xlu1 %v2603_v14, %s2505_s28  ;;  %3571 = vst [vmem:[#allocation28_spill] sm:$0xff] %v2818_v60  ;;  %2130 = vmatprep.subr.mxu1 %v3534_v59 }
  0x36   :  { %265 = vrot.lane.b32.xlu0 %v2605_v15, %s2505_s28  ;;  %2131 = vmatpush3.msra.mxu1 %v2810_v0  ;;  %v473_v0 = vld [vmem:[#allocation2 + $0x48] sm:$0xff] }
  0x37   :  { %2132 = vmatprep.subr.mxu1 %v3534_v59 }
  0x39   :  { %229 = vrot.lane.b32.xlu1 %v2611_v16, %s2505_s28 }
  0x3a   :  { %191 = vrot.lane.b32.xlu0 %v2613_v17, %s2505_s28 }
  0x3d   :  { %303 = vrot.lane.b32.xlu1 %v2619_v18, %s2505_s28 }
  0x3e   :  { %267 = vrot.lane.b32.xlu0 %v2621_v19, %s2505_s28 }
  0x41   :  { %152 = vrot.lane.b32.xlu1 %v2627_v20, %s2505_s28 }
  0x42   :  { %305 = vrot.lane.b32.xlu0 %v2629_v21, %s2505_s28 }
  0x45   :  { %231 = vrot.lane.b32.xlu1 %v2635_v22, %s2505_s28 }
  0x46   :  { %193 = vrot.lane.b32.xlu0 %v2637_v23, %s2505_s28 }
  0x49   :  { %307 = vrot.lane.b32.xlu1 %v2643_v24, %s2505_s28 }
  0x4a   :  { %269 = vrot.lane.b32.xlu0 %v2645_v25, %s2505_s28 }
  0x4d   :  { %345 = vrot.lane.b32.xlu1 %v2651_v26, %s2505_s28 }
  0x4e   :  { %343 = vrot.lane.b32.xlu0 %v2653_v27, %s2505_s28 }
  0x51   :  { %195 = vrot.lane.b32.xlu1 %v2659_v28, %s2505_s28 }
  0x52   :  { %154 = vrot.lane.b32.xlu0 %v2661_v29, %s2505_s28 }
  0x55   :  { %271 = vrot.lane.b32.xlu1 %v2667_v30, %s2505_s28 }
  0x56   :  { %233 = vrot.lane.b32.xlu0 %v2669_v31, %s2505_s28 }
  0x59   :  { %347 = vrot.lane.b32.xlu1 %v2675_v32, %s2505_s28 }
  0x5a   :  { %309 = vrot.lane.b32.xlu0 %v2677_v33, %s2505_s28 }
  0x5d   :  { %385 = vrot.lane.b32.xlu1 %v2683_v34, %s2505_s28 }
  0x5e   :  { %383 = vrot.lane.b32.xlu0 %v2685_v35, %s2505_s28 }
  0x61   :  { %197 = vrot.lane.b32.xlu1 %v2691_v36, %s2505_s28 }
  0x62   :  { %156 = vrot.lane.b32.xlu0 %v2693_v37, %s2505_s28 }
  0x65   :  { %273 = vrot.lane.b32.xlu1 %v2699_v38, %s2505_s28 }
  0x66   :  { %235 = vrot.lane.b32.xlu0 %v2701_v39, %s2505_s28 }
  0x69   :  { %349 = vrot.lane.b32.xlu1 %v2707_v40, %s2505_s28 }
  0x6a   :  { %311 = vrot.lane.b32.xlu0 %v2709_v41, %s2505_s28 }
  0x6d   :  { %423 = vrot.lane.b32.xlu1 %v2715_v42, %s2505_s28 }
  0x6e   :  { %387 = vrot.lane.b32.xlu0 %v2717_v43, %s2505_s28 }
  0x71   :  { %237 = vrot.lane.b32.xlu1 %v2723_v44, %s2505_s28 }
  0x72   :  { %425 = vrot.lane.b32.xlu0 %v2725_v45, %s2505_s28 }
  0x75   :  { %313 = vrot.lane.b32.xlu1 %v2731_v46, %s2505_s28 }
  0x76   :  { %275 = vrot.lane.b32.xlu0 %v2733_v47, %s2505_s28 }
  0x79   :  { %389 = vrot.lane.b32.xlu1 %v2739_v48, %s2505_s28 }
  0x7a   :  { %351 = vrot.lane.b32.xlu0 %v2741_v49, %s2505_s28 }
  0x7d   :  { %277 = vrot.lane.b32.xlu1 %v2747_v50, %s2505_s28 }
  0x7e   :  { %427 = vrot.lane.b32.xlu0 %v2749_v51, %s2505_s28 }
  0x81   :  { %353 = vrot.lane.b32.xlu1 %v2755_v52, %s2505_s28 }
  0x82   :  { %315 = vrot.lane.b32.xlu0 %v2757_v53, %s2505_s28 }
  0x85   :  { %429 = vrot.lane.b32.xlu1 %v2763_v54, %s2505_s28  ;;  %v2839_v54 = vld [vmem:[%s3500_s3 + $0x50] sm:$0xff] }
  0x86   :  { %391 = vrot.lane.b32.xlu0 %v2765_v55, %s2505_s28  ;;  %3573 = vst [vmem:[#allocation30_spill] sm:$0xff] %v2839_v54 }
  0x89   :  { %355 = vrot.lane.b32.xlu1 %v2776_v57, %s2505_s28  ;;  %v455_v57 = vld [vmem:[#allocation2] sm:$0xff] }
  0x8a   :  { %317 = vrot.lane.b32.xlu0 %v2778_v58, %s2505_s28  ;;  %v2816_v58 = vld [vmem:[#allocation5 + $0x1b0] sm:$0xff] }
  0x8b   :  { %3570 = vst [vmem:[#allocation27_spill] sm:$0xff] %v2816_v58 }
  0x8d   :  { %431 = vrot.lane.b32.xlu1 %v2800_v62, %s2505_s28  ;;  %v2825_v62 = vld [vmem:[%s3500_s3 + $0x58] sm:$0xff] }
  0x8e   :  { %393 = vrot.lane.b32.xlu0 %v2802_v63, %s2505_s28  ;;  %3572 = vst [vmem:[#allocation29_spill] sm:$0xff] %v2825_v62  ;;  %2133 = vmatpush3.msra.mxu1 %v2825_v62 }
  0x8f   :  { %v184_v61 = vpop.permute.xlu1 %183  ;;  %2134 = vmatprep.subr.mxu1 %v3534_v59 }
  0x90   :  { %v143_v53 = vpop.permute.xlu0 %142  ;;  %v207_v63 = vsel %vm166_vm1, %v2541_v1, %v184_v61  ;;  %v456_v1 = vld [vmem:[#allocation2 + $0x8] sm:$0xff]  ;;  %v2841_v61 = vld [vmem:[#allocation5 + $0x1b8] sm:$0xff]  ;;  %2135 = vmatpush3.msra.mxu1 %v2839_v54 }
  0x91   :  { %v167_v52 = vsel %vm166_vm1, %v2543_v2, %v143_v53  ;;  %v480_v50 = vmul.f32 %v472_v56, %v207_v63  ;;  %395 = vrot.lane.b32.xlu1 %v2816_v58, %s2505_s28  ;;  %3574 = vst [vmem:[#allocation31_spill] sm:$0xff] %v2841_v61  ;;  %v2843_v2 = vld [vmem:[#allocation5 + $0x1e8] sm:$0xff]  ;;  %2136 = vmatprep.subr.mxu1 %v3534_v59 }
  0x92   :  { %v463_v55 = vmul.f32 %v455_v57, %v167_v52  ;;  %357 = vrot.lane.b32.xlu0 %v2818_v60, %s2505_s28  ;;  %3575 = vst [vmem:[#allocation32_spill] sm:$0xff] %v2843_v2  ;;  %v2855_v58 = vld [vmem:[%s3500_s3 + $0x48] sm:$0xff] }
  0x93   :  { %v186_v53 = vpop.permute.xlu1 %185  ;;  %3576 = vst [vmem:[#allocation33_spill] sm:$0xff] %v2855_v58  ;;  %2137 = vmatpush3.msra.mxu1 %v2855_v58 }
  0x94   :  { %v488_v52 = vadd.f32 %v480_v50, %v463_v55  ;;  %v145_v56 = vpop.permute.xlu0 %144  ;;  %v208_v57 = vsel %vm166_vm1, %v2555_v4, %v186_v53  ;;  %v474_v50 = vld [vmem:[#allocation2 + $0x50] sm:$0xff]  ;;  %v2861_v55 = vld [vmem:[#allocation5 + $0x1f8] sm:$0xff]  ;;  %2138 = vmatprep.subr.mxu1 %v3534_v59 }
  0x95   :  { %v168_v63 = vsel %vm166_vm1, %v2557_v5, %v145_v56  ;;  %v481_v60 = vmul.f32 %v473_v0, %v208_v57  ;;  %397 = vrot.lane.b32.xlu1 %v2841_v61, %s2505_s28  ;;  %v457_v4 = vld [vmem:[#allocation2 + $0x10] sm:$0xff]  ;;  %3577 = vst [vmem:[#allocation34_spill] sm:$0xff] %v2861_v55  ;;  %v2870_v0 = vld [vmem:[%s3500_s3 + $0x40] sm:$0xff] }
  0x96   :  { %v464_v62 = vmul.f32 %v456_v1, %v168_v63  ;;  %433 = vrot.lane.b32.xlu0 %v2843_v2, %s2505_s28  ;;  %v2863_v5 = vld [vmem:[#allocation5 + $0x1f0] sm:$0xff]  ;;  %3579 = vst [vmem:[#allocation36_spill] sm:$0xff] %v2870_v0  ;;  %2139 = vmatpush3.msra.mxu1 %v2870_v0 }
  0x97   :  { %3578 = vst [vmem:[#allocation35_spill] sm:$0xff] %v2863_v5  ;;  %v188_v56 = vpop.permute.xlu1 %187  ;;  %2140 = vmatprep.subr.mxu1 %v3534_v59 }
  0x98   :  { %v489_v53 = vadd.f32 %v481_v60, %v464_v62  ;;  %v147_v54 = vpop.permute.xlu0 %146  ;;  %v209_v1 = vsel %vm166_vm1, %v2565_v6, %v188_v56  ;;  %v2884_v60 = vld [vmem:[%s3500_s3 + $0x38] sm:$0xff]  ;;  %v498_v62 = vld [vmem:[#allocation2 + $0x88] sm:$0xff]  ;;  %v497_v6 = vld [vmem:[#allocation2 + $0x80] sm:$0xff] }
  0x99   :  { %v169_v57 = vsel %vm166_vm1, %v2567_v7, %v147_v54  ;;  %v482_v63 = vmul.f32 %v474_v50, %v209_v1  ;;  %437 = vrot.lane.b32.xlu1 %v2861_v55, %s2505_s28  ;;  %3580 = vst [vmem:[#allocation37_spill] sm:$0xff] %v2884_v60  ;;  %v2891_v50 = vld [vmem:[%s3500_s3 + $0x30] sm:$0xff]  ;;  %2141 = vmatpush3.msra.mxu1 %v2884_v60 }
  0x9a   :  { %v465_v2 = vmul.f32 %v457_v4, %v169_v57  ;;  %435 = vrot.lane.b32.xlu0 %v2863_v5, %s2505_s28  ;;  %3581 = vst [vmem:[#allocation38_spill] sm:$0xff] %v2891_v50  ;;  %2142 = vmatprep.subr.mxu1 %v3534_v59  ;;  %v461_v5 = vld [vmem:[#allocation2 + $0x30] sm:$0xff] }
  0x9b   :  { %v226_v54 = vpop.permute.xlu1 %225  ;;  %2143 = vmatpush3.msra.mxu1 %v2891_v50 }
  0x9c   :  { %v490_v7 = vadd.f32 %v482_v63, %v465_v2  ;;  %v224_v56 = vpop.permute.xlu0 %223  ;;  %v248_v4 = vsel %vm166_vm1, %v2575_v8, %v226_v54  ;;  %v2904_v63 = vld [vmem:[%s3500_s3 + $0x28] sm:$0xff]  ;;  %v475_v8 = vld [vmem:[#allocation2 + $0x58] sm:$0xff]  ;;  %2144 = vmatprep.subr.mxu1 %v3534_v59 }
  0x9d   :  { %v247_v1 = vsel %vm166_vm1, %v2577_v9, %v224_v56  ;;  %v506_v2 = vmul.f32 %v498_v62, %v248_v4  ;;  %3582 = vst [vmem:[#allocation39_spill] sm:$0xff] %v2904_v63  ;;  %v458_v9 = vld [vmem:[#allocation2 + $0x18] sm:$0xff]  ;;  %v2913_v62 = vld [vmem:[%s3500_s3 + $0x20] sm:$0xff]  ;;  %2145 = vmatpush3.msra.mxu1 %v2904_v63 }
  0x9e   :  { %v505_v57 = vmul.f32 %v497_v6, %v247_v1  ;;  %3583 = vst [vmem:[#allocation40_spill] sm:$0xff] %v2913_v62  ;;  %2146 = vmatprep.subr.mxu1 %v3534_v59 }
  0x9f   :  { %v514_v54 = vadd.f32 %v506_v2, %v489_v53  ;;  %v190_v60 = vpop.permute.xlu1 %189  ;;  %v522_v2 = vld [vmem:[#allocation2 + $0xc0] sm:$0xff]  ;;  %2147 = vmatpush3.msra.mxu1 %v2913_v62 }
  0xa0   :  { %v513_v56 = vadd.f32 %v505_v57, %v488_v52  ;;  %v149_v0 = vpop.permute.xlu0 %148  ;;  %v210_v6 = vsel %vm166_vm1, %v2585_v10, %v190_v60  ;;  %v2924_v52 = vld [vmem:[%s3500_s3 + $0x18] sm:$0xff]  ;;  %v499_v57 = vld [vmem:[#allocation2 + $0x90] sm:$0xff]  ;;  %2148 = vmatprep.subr.mxu1 %v3534_v59 }
  0xa1   :  { %v170_v4 = vsel %vm166_vm1, %v2587_v11, %v149_v0  ;;  %v483_v1 = vmul.f32 %v475_v8, %v210_v6  ;;  %3584 = vst [vmem:[#allocation41_spill] sm:$0xff] %v2924_v52  ;;  %v2931_v11 = vld [vmem:[%s3500_s3 + $0x10] sm:$0xff]  ;;  %2149 = vmatpush3.msra.mxu1 %v2924_v52 }
  0xa2   :  { %v466_v53 = vmul.f32 %v458_v9, %v170_v4  ;;  %3585 = vst [vmem:[#allocation42_spill] sm:$0xff] %v2931_v11  ;;  %2150 = vmatprep.subr.mxu1 %v3534_v59  ;;  %v2942_v4 = vld [vmem:[%s3500_s3 + $0x8] sm:$0xff] }
  0xa3   :  { %v264_v10 = vpop.permute.xlu1 %263  ;;  %3586 = vst [vmem:[#allocation43_spill] sm:$0xff] %v2942_v4  ;;  %2151 = vmatpush3.msra.mxu1 %v2931_v11 }
  0xa4   :  { %v491_v50 = vadd.f32 %v483_v1, %v466_v53  ;;  %v228_v60 = vpop.permute.xlu0 %227  ;;  %v287_v0 = vsel %vm166_vm1, %v2595_v12, %v264_v10  ;;  %v523_v1 = vld [vmem:[#allocation2 + $0xc8] sm:$0xff]  ;;  %2152 = vmatprep.subr.mxu1 %v3534_v59 }
  0xa5   :  { %v249_v8 = vsel %vm166_vm1, %v2597_v13, %v228_v60  ;;  %v530_v9 = vmul.f32 %v522_v2, %v287_v0  ;;  %v2949_v13 = vld [vmem:[%s3500_s3] sm:$0xff]  ;;  %2153 = vmatpush3.msra.mxu1 %v2942_v4 }
  0xa6   :  { %v507_v6 = vmul.f32 %v499_v57, %v249_v8  ;;  %3587 = vst [vmem:[#allocation44_spill] sm:$0xff] %v2949_v13  ;;  %2154 = vmatprep.subr.mxu1 %v3534_v59  ;;  %v459_v60 = vld [vmem:[#allocation2 + $0x20] sm:$0xff] }
  0xa7   :  { %v538_v53 = vadd.f32 %v530_v9, %v513_v56  ;;  %v151_v12 = vpop.permute.xlu1 %150  ;;  %v500_v56 = vld [vmem:[#allocation2 + $0x98] sm:$0xff]  ;;  %v476_v0 = vld [vmem:[#allocation2 + $0x60] sm:$0xff]  ;;  %2155 = vmatpush3.msra.mxu1 %v2949_v13 }
  0xa8   :  { %v515_v62 = vadd.f32 %v507_v6, %v490_v7  ;;  %v266_v10 = vpop.permute.xlu0 %265  ;;  %v171_v7 = vsel %vm166_vm1, %v2603_v14, %v151_v12  ;;  %2208 = vmatprep.subr.mxu1 %v2548_v3  ;;  %v547_v4 = vld [vmem:[#allocation2 + $0x100] sm:$0xff]  ;;  %v524_v14 = vld [vmem:[#allocation2 + $0xd0] sm:$0xff] }
  0xa9   :  { %v288_v2 = vsel %vm166_vm1, %v2605_v15, %v266_v10  ;;  %v467_v10 = vmul.f32 %v459_v60, %v171_v7 }
  0xaa   :  { %v531_v57 = vmul.f32 %v523_v1, %v288_v2 }
  0xab   :  { %v230_v9 = vpop.permute.xlu1 %229 }
  0xac   :  { %v539_v8 = vadd.f32 %v531_v57, %v514_v54  ;;  %v192_v6 = vpop.permute.xlu0 %191  ;;  %v250_v15 = vsel %vm166_vm1, %v2611_v16, %v230_v9  ;;  %v548_v9 = vld [vmem:[#allocation2 + $0x108] sm:$0xff] }
  0xad   :  { %v211_v1 = vsel %vm166_vm1, %v2613_v17, %v192_v6  ;;  %v508_v2 = vmul.f32 %v500_v56, %v250_v15  ;;  %v460_v56 = vld [vmem:[#allocation2 + $0x28] sm:$0xff] }
  0xae   :  { %v484_v59 = vmul.f32 %v476_v0, %v211_v1  ;;  %v549_v1 = vld [vmem:[#allocation2 + $0x110] sm:$0xff] }
  0xaf   :  { %v516_v12 = vadd.f32 %v508_v2, %v491_v50  ;;  %v304_v52 = vpop.permute.xlu1 %303 }
  0xb0   :  { %v492_v11 = vadd.f32 %v484_v59, %v467_v10  ;;  %v268_v13 = vpop.permute.xlu0 %267  ;;  %v327_v54 = vsel %vm166_vm1, %v2619_v18, %v304_v52  ;;  %v501_v18 = vld [vmem:[#allocation2 + $0xa0] sm:$0xff]  ;;  %v477_v52 = vld [vmem:[#allocation2 + $0x68] sm:$0xff]  ;;  %v525_v10 = vld [vmem:[#allocation2 + $0xd8] sm:$0xff] }
  0xb1   :  { %v289_v3 = vsel %vm166_vm1, %v2621_v19, %v268_v13  ;;  %v555_v57 = vmul.f32 %v547_v4, %v327_v54 }
  0xb2   :  { %v532_v16 = vmul.f32 %v524_v14, %v289_v3 }
  0xb3   :  { %v2967_v63 = vadd.f32 %v555_v57, %v538_v53  ;;  %v153_v60 = vpop.permute.xlu1 %152 }
  0xb4   :  { %v540_v17 = vadd.f32 %v532_v16, %v515_v62  ;;  %v306_v7 = vpop.permute.xlu0 %305  ;;  %v172_v0 = vsel %vm166_vm1, %v2627_v20, %v153_v60 }
  0xb5   :  { %v328_v50 = vsel %vm166_vm1, %v2629_v21, %v306_v7  ;;  %v468_v13 = vmul.f32 %v460_v56, %v172_v0 }
  0xb6   :  { %v556_v59 = vmul.f32 %v548_v9, %v328_v50 }
  0xb7   :  { %v232_v19 = vpop.permute.xlu1 %231 }
  0xb8   :  { %v2973_v6 = vadd.f32 %v556_v59, %v539_v8  ;;  %v194_v4 = vpop.permute.xlu0 %193  ;;  %v251_v53 = vsel %vm166_vm1, %v2635_v22, %v232_v19 }
  0xb9   :  { %v212_v62 = vsel %vm166_vm1, %v2637_v23, %v194_v4  ;;  %v509_v15 = vmul.f32 %v501_v18, %v251_v53 }
  0xba   :  { %v485_v21 = vmul.f32 %v477_v52, %v212_v62 }
  0xbb   :  { %v2979_v2 = vadd.f32 %v509_v15, %v492_v11  ;;  %v308_v14 = vpop.permute.xlu1 %307 }
  0xbc   :  { %v2981_v20 = vadd.f32 %v485_v21, %v468_v13  ;;  %v270_v8 = vpop.permute.xlu0 %269  ;;  %v329_v54 = vsel %vm166_vm1, %v2643_v24, %v308_v14 }
  0xbd   :  { %v290_v22 = vsel %vm166_vm1, %v2645_v25, %v270_v8  ;;  %v557_v3 = vmul.f32 %v549_v1, %v329_v54  ;;  %v572_v8 = vld [vmem:[#allocation2 + $0x140] sm:$0xff] }
  0xbe   :  { %v533_v57 = vmul.f32 %v525_v10, %v290_v22  ;;  %v573_v10 = vld [vmem:[#allocation2 + $0x148] sm:$0xff] }
  0xbf   :  { %v2987_v23 = vadd.f32 %v557_v3, %v540_v17  ;;  %v346_v9 = vpop.permute.xlu1 %345 }
  0xc0   :  { %v2989_v16 = vadd.f32 %v533_v57, %v516_v12  ;;  %v344_v60 = vpop.permute.xlu0 %343  ;;  %v368_v14 = vsel %vm166_vm1, %v2651_v26, %v346_v9  ;;  %v478_v57 = vld [vmem:[#allocation2 + $0x70] sm:$0xff]  ;;  %v526_v9 = vld [vmem:[#allocation2 + $0xe0] sm:$0xff] }
  0xc1   :  { %v367_v54 = vsel %vm166_vm1, %v2653_v27, %v344_v60  ;;  %v581_v61 = vmul.f32 %v573_v10, %v368_v14  ;;  %v502_v60 = vld [vmem:[#allocation2 + $0xa8] sm:$0xff]  ;;  %v479_v14 = vld [vmem:[#allocation2 + $0x78] sm:$0xff] }
  0xc2   :  { %v580_v47 = vmul.f32 %v572_v8, %v367_v54  ;;  %v575_v8 = vld [vmem:[#allocation2 + $0x158] sm:$0xff] }
  0xc3   :  { %v196_v11 = vpop.permute.xlu1 %195 }
  0xc4   :  { %v155_v7 = vpop.permute.xlu0 %154  ;;  %v213_v58 = vsel %vm166_vm1, %v2659_v28, %v196_v11  ;;  %v574_v28 = vld [vmem:[#allocation2 + $0x150] sm:$0xff]  ;;  %v550_v11 = vld [vmem:[#allocation2 + $0x118] sm:$0xff] }
  0xc5   :  { %v173_v55 = vsel %vm166_vm1, %v2661_v29, %v155_v7  ;;  %v597_v7 = vld [vmem:[#allocation2 + $0x180] sm:$0xff] }
  0xc6   :  { %v469_v26 = vmul.f32 %v461_v5, %v173_v55  ;;  %v589_v55 = vadd.f32 %v581_v61, %v2973_v6  ;;  %v598_v5 = vld [vmem:[#allocation2 + $0x188] sm:$0xff]  ;;  %v622_v6 = vld [vmem:[#allocation2 + $0x1c0] sm:$0xff] }
  0xc7   :  { %v272_v50 = vpop.permute.xlu1 %271 }
  0xc8   :  { %v234_v59 = vpop.permute.xlu0 %233  ;;  %v291_v27 = vsel %vm166_vm1, %v2667_v30, %v272_v50  ;;  %v588_v30 = vadd.f32 %v580_v47, %v2967_v63 }
  0xc9   :  { %v252_v46 = vsel %vm166_vm1, %v2669_v31, %v234_v59  ;;  %v534_v59 = vmul.f32 %v526_v9, %v291_v27 }
  0xca   :  { %v510_v10 = vmul.f32 %v502_v60, %v252_v46 }
  0xcb   :  { %v348_v56 = vpop.permute.xlu1 %347 }
  0xcc   :  { %v310_v0 = vpop.permute.xlu0 %309  ;;  %v369_v29 = vsel %vm166_vm1, %v2675_v32, %v348_v56  ;;  %v462_v56 = vld [vmem:[#allocation2 + $0x38] sm:$0xff] }
  0xcd   :  { %v582_v47 = vmul.f32 %v574_v28, %v369_v29  ;;  %v504_v29 = vld [vmem:[#allocation2 + $0xb8] sm:$0xff] }
  0xcf   :  { %v386_v18 = vpop.permute.xlu1 %385 }
  0xd0   :  { %v384_v52 = vpop.permute.xlu0 %383  ;;  %v408_v31 = vsel %vm166_vm1, %v2683_v34, %v386_v18 }
  0xd1   :  { %v407_v50 = vsel %vm166_vm1, %v2685_v35, %v384_v52  ;;  %v606_v46 = vmul.f32 %v598_v5, %v408_v31  ;;  %v527_v52 = vld [vmem:[#allocation2 + $0xe8] sm:$0xff] }
  0xd2   :  { %v605_v18 = vmul.f32 %v597_v7, %v407_v50 }
  0xd3   :  { %v198_v24 = vpop.permute.xlu1 %197 }
  0xd4   :  { %v157_v19 = vpop.permute.xlu0 %156  ;;  %v214_v32 = vsel %vm166_vm1, %v2691_v36, %v198_v24  ;;  %v503_v24 = vld [vmem:[#allocation2 + $0xb0] sm:$0xff] }
  0xd7   :  { %v274_v4 = vpop.permute.xlu1 %273 }
  0xd8   :  { %v236_v25 = vpop.permute.xlu0 %235  ;;  %v292_v36 = vsel %vm166_vm1, %v2699_v38, %v274_v4  ;;  %v623_v4 = vld [vmem:[#allocation2 + $0x1c8] sm:$0xff] }
  0xd9   :  { %v535_v27 = vmul.f32 %v527_v52, %v292_v36  ;;  %v625_v52 = vld [vmem:[#allocation2 + $0x1d8] sm:$0xff] }
  0xdb   :  { %v350_v53 = vpop.permute.xlu1 %349 }
  0xdc   :  { %v312_v62 = vpop.permute.xlu0 %311 }
  0xdd   :  { %v331_v54 = vsel %vm166_vm1, %v2709_v41, %v312_v62 }
  0xdf   :  { %v424_v17 = vpop.permute.xlu1 %423 }
  0xe0   :  { %v2991_v13 = vpop.permute.xlu0 %387  ;;  %v447_v34 = vsel %vm166_vm1, %v2715_v42, %v424_v17  ;;  %v370_v42 = vsel %vm166_vm1, %v2707_v40, %v350_v53  ;;  %v551_v17 = vld [vmem:[#allocation2 + $0x120] sm:$0xff]  ;;  %v599_v53 = vld [vmem:[#allocation2 + $0x190] sm:$0xff] }
  0xe1   :  { %v630_v9 = vmul.f32 %v622_v6, %v447_v34  ;;  %v3051_v38 = vpop.f32.mrf.mxu0  ;;  %v409_v41 = vsel %vm166_vm1, %v2717_v43, %v2991_v13  ;;  %v583_v60 = vmul.f32 %v575_v8, %v370_v42  ;;  %v559_v28 = vmul.f32 %v551_v17, %v331_v54  ;;  %v600_v43 = vld [vmem:[#allocation2 + $0x198] sm:$0xff]  ;;  %v528_v6 = vld [vmem:[#allocation2 + $0xf0] sm:$0xff]  ;;  %v601_v8 = vld [vmem:[#allocation2 + $0x1a0] sm:$0xff] }
  0xe2   :  { %v607_v31 = vmul.f32 %v599_v53, %v409_v41  ;;  %v3596_v42 = vld [vmem:[#allocation18_spill] sm:$0xff]  ;;  %v577_v53 = vld [vmem:[#allocation2 + $0x168] sm:$0xff] }
  0xe3   :  { %v2993_v12 = vpop.permute.xlu1 %237  ;;  %v717_v7 = vpop.f32.mrf.mxu0 }
  0xe4   :  { %v2995_v15 = vpop.permute.xlu0 %425 }
  0xe7   :  { %v2997_v21 = vpop.permute.xlu1 %313 }
  0xe8   :  { %3588 = vst [vmem:[#allocation45_spill] sm:$0xff] %v2997_v21  ;;  %v2999_v1 = vpop.permute.xlu0 %275 }
  0xe9   :  { %3589 = vst [vmem:[#allocation46_spill] sm:$0xff] %v2999_v1  ;;  %v486_v1 = vmul.f32 %v478_v57, %v213_v58  ;;  %v330_v58 = vsel %vm166_vm1, %v2677_v33, %v310_v0  ;;  %v174_v33 = vsel %vm166_vm1, %v2693_v37, %v157_v19  ;;  %v253_v37 = vsel %vm166_vm1, %v2701_v39, %v236_v25 }
  0xea   :  { %v558_v63 = vmul.f32 %v550_v11, %v330_v58  ;;  %v487_v19 = vmul.f32 %v479_v14, %v214_v32  ;;  %v542_v57 = vadd.f32 %v534_v59, %v2979_v2  ;;  %v448_v39 = vsel %vm166_vm1, %v2725_v45, %v2995_v15  ;;  %v3590_v59 = vld [vmem:[#allocation14_spill] sm:$0xff] }
  0xeb   :  { %v3005_v22 = vpop.permute.xlu1 %389  ;;  %v494_v61 = vadd.f32 %v486_v1, %v469_v26  ;;  %v470_v1 = vmul.f32 %v462_v56, %v174_v33  ;;  %v518_v26 = vadd.f32 %v510_v10, %v2981_v20  ;;  %v590_v25 = vadd.f32 %v582_v47, %v2987_v23  ;;  %v552_v47 = vld [vmem:[#allocation2 + $0x128] sm:$0xff] }
  0xec   :  { %v3007_v3 = vpop.permute.xlu0 %351  ;;  %v511_v40 = vmul.f32 %v503_v24, %v253_v37  ;;  %v613_v20 = vadd.f32 %v605_v18, %v588_v30  ;;  %v254_v11 = vsel %vm166_vm1, %v2723_v44, %v2993_v12  ;;  %v566_v45 = vadd.f32 %v558_v63, %v2989_v16  ;;  %v576_v30 = vld [vmem:[#allocation2 + $0x160] sm:$0xff] }
  0xed   :  { %v614_v23 = vadd.f32 %v606_v46, %v589_v55  ;;  %v495_v15 = vadd.f32 %v487_v19, %v470_v1  ;;  %v631_v58 = vmul.f32 %v623_v4, %v448_v39  ;;  %v410_v13 = vsel %vm166_vm1, %v2739_v48, %v3005_v22  ;;  %v624_v55 = vld [vmem:[#allocation2 + $0x1d0] sm:$0xff]  ;;  %v3592_v48 = vld [vmem:[#allocation11_spill] sm:$0xff]  ;;  %v2117_v1 = vpop.f32.mrf.mxu0 }
  0xee   :  { %v3064_v5 = vadd.f32 %v630_v9, %v613_v20  ;;  %v371_v50 = vsel %vm166_vm1, %v2741_v49, %v3007_v3  ;;  %v543_v44 = vadd.f32 %v535_v27, %v518_v26  ;;  %v519_v12 = vadd.f32 %v511_v40, %v494_v61  ;;  %v3594_v49 = vld [vmem:[#allocation12_spill] sm:$0xff]  ;;  %v529_v9 = vld [vmem:[#allocation2 + $0xf8] sm:$0xff] }
  0xef   :  { %v3017_v21 = vpop.permute.xlu1 %277  ;;  %v512_v16 = vmul.f32 %v504_v29, %v254_v11  ;;  %v591_v56 = vadd.f32 %v583_v60, %v566_v45  ;;  %v567_v33 = vadd.f32 %v559_v28, %v542_v57  ;;  %v3591_v63 = vld [vmem:[#allocation45_spill] sm:$0xff]  ;;  %v3081_v61 = vadd.f32 %v631_v58, %v614_v23  ;;  %v3599_v20 = vld [vmem:[#allocation16_spill] sm:$0xff]  ;;  %v626_v28 = vld [vmem:[#allocation2 + $0x1e0] sm:$0xff] }
  0xf0   :  { %v3019_v51 = vpop.permute.xlu0 %427  ;;  %v332_v22 = vsel %vm166_vm1, %v3592_v48, %v3591_v63  ;;  %v3593_v34 = vld [vmem:[#allocation46_spill] sm:$0xff]  ;;  %v608_v46 = vmul.f32 %v600_v43, %v410_v13  ;;  %v584_v18 = vmul.f32 %v576_v30, %v371_v50  ;;  %v615_v24 = vadd.f32 %v607_v31, %v590_v25  ;;  %v3597_v4 = vld [vmem:[#allocation13_spill] sm:$0xff]  ;;  %v3598_v25 = vld [vmem:[#allocation15_spill] sm:$0xff] }
  0xf1   :  { %v449_v10 = vsel %vm166_vm1, %v3590_v59, %v3019_v51  ;;  %v293_v3 = vsel %vm166_vm1, %v3594_v49, %v3593_v34  ;;  %v3595_v51 = vld [vmem:[#allocation17_spill] sm:$0xff]  ;;  %v756_v37 = vmul.f32 %v717_v7, %v3064_v5  ;;  %v520_v54 = vadd.f32 %v512_v16, %v495_v15  ;;  %v3600_v29 = vld [vmem:[#allocation24_spill] sm:$0xff] }
  0xf2   :  { %v632_v19 = vmul.f32 %v624_v55, %v449_v10  ;;  %v560_v57 = vmul.f32 %v552_v47, %v332_v22  ;;  %v536_v26 = vmul.f32 %v528_v6, %v293_v3  ;;  %v294_v39 = vsel %vm166_vm1, %v3597_v4, %v3017_v21  ;;  %v554_v7 = vld [vmem:[#allocation2 + $0x138] sm:$0xff]  ;;  %v578_v59 = vld [vmem:[#allocation2 + $0x170] sm:$0xff] }
  0xf3   :  { %v3037_v0 = vpop.permute.xlu1 %353  ;;  %v757_v21 = vmul.f32 %v3051_v38, %v3081_v61  ;;  %v616_v45 = vadd.f32 %v608_v46, %v591_v56  ;;  %v592_v23 = vadd.f32 %v584_v18, %v567_v33  ;;  %v537_v58 = vmul.f32 %v529_v9, %v294_v39  ;;  %v3601_v43 = vld [vmem:[#allocation21_spill] sm:$0xff]  ;;  %v3603_v10 = vld [vmem:[#allocation20_spill] sm:$0xff] }
  0xf4   :  { %v3039_v35 = vpop.permute.xlu0 %315  ;;  %v372_v41 = vsel %vm166_vm1, %v3598_v25, %v3037_v0  ;;  %v3101_v31 = vadd.f32 %v632_v19, %v615_v24  ;;  %v727_v0 = vpop.f32.mrf.mxu0  ;;  %v3602_v30 = vld [vmem:[#allocation25_spill] sm:$0xff]  ;;  %v568_v63 = vadd.f32 %v560_v57, %v543_v44  ;;  %v544_v48 = vadd.f32 %v536_v26, %v519_v12 }
  0xf5   :  { %v585_v16 = vmul.f32 %v577_v53, %v372_v41  ;;  %v579_v34 = vld [vmem:[#allocation2 + $0x178] sm:$0xff]  ;;  %v545_v24 = vadd.f32 %v537_v58, %v520_v54  ;;  %v3606_v53 = vld [vmem:[#allocation31_spill] sm:$0xff]  ;;  %v3607_v54 = vld [vmem:[#allocation32_spill] sm:$0xff] }
  0xf6   :  { %v2120_v6 = vpop.f32.mrf.mxu0  ;;  %v758_v19 = vmul.f32 %v727_v0, %v3101_v31  ;;  %v604_v12 = vld [vmem:[#allocation2 + $0x1b8] sm:$0xff] }
  0xf7   :  { %v430_v2 = vpop.permute.xlu1 %429 }
  0xf8   :  { %v392_v62 = vpop.permute.xlu0 %391  ;;  %v450_v36 = vsel %vm166_vm1, %v3595_v51, %v430_v2  ;;  %v553_v2 = vld [vmem:[#allocation2 + $0x130] sm:$0xff]  ;;  %v3605_v51 = vld [vmem:[#allocation27_spill] sm:$0xff] }
  0xf9   :  { %v411_v17 = vsel %vm166_vm1, %v3596_v42, %v392_v62  ;;  %v333_v62 = vsel %vm166_vm1, %v3599_v20, %v3039_v35  ;;  %v633_v60 = vmul.f32 %v625_v52, %v450_v36  ;;  %v602_v35 = vld [vmem:[#allocation2 + $0x1a8] sm:$0xff]  ;;  %v603_v52 = vld [vmem:[#allocation2 + $0x1b0] sm:$0xff]  ;;  %v593_v42 = vadd.f32 %v585_v16, %v568_v63 }
  0xfa   :  { %v609_v15 = vmul.f32 %v601_v8, %v411_v17  ;;  %v561_v55 = vmul.f32 %v553_v2, %v333_v62  ;;  %v627_v8 = vld [vmem:[#allocation2 + $0x1e8] sm:$0xff] }
  0xfb   :  { %v356_v14 = vpop.permute.xlu1 %355  ;;  %v3109_v22 = vadd.f32 %v633_v60, %v616_v45 }
  0xfc   :  { %v318_v32 = vpop.permute.xlu0 %317  ;;  %v373_v38 = vsel %vm166_vm1, %v3603_v10, %v356_v14  ;;  %v617_v3 = vadd.f32 %v609_v15, %v592_v23  ;;  %v764_v14 = vadd.f32 %v757_v21, %v756_v37  ;;  %v569_v17 = vadd.f32 %v561_v55, %v544_v48 }
  0xfd   :  { %v334_v13 = vsel %vm166_vm1, %v3601_v43, %v318_v32  ;;  %v3604_v32 = vld [vmem:[#allocation28_spill] sm:$0xff]  ;;  %v586_v44 = vmul.f32 %v578_v59, %v373_v38 }
  0xfe   :  { %v562_v46 = vmul.f32 %v554_v7, %v334_v13  ;;  %v765_v60 = vadd.f32 %v764_v14, %v758_v19  ;;  %v3608_v7 = vld [vmem:[#allocation34_spill] sm:$0xff]  ;;  %v3609_v13 = vld [vmem:[#allocation35_spill] sm:$0xff]  ;;  %v3610_v14 = vmov 0.0  }
  0xff   :  { %v432_v27 = vpop.permute.xlu1 %431 }
 0x100   :  { %v394_v40 = vpop.permute.xlu0 %393  ;;  %v451_v11 = vsel %vm166_vm1, %v3600_v29, %v432_v27  ;;  %v737_v27 = vpop.f32.mrf.mxu0  ;;  %v570_v41 = vadd.f32 %v562_v46, %v545_v24  ;;  %v629_v29 = vld [vmem:[#allocation2 + $0x1f8] sm:$0xff] }
 0x101   :  { %v412_v50 = vsel %vm166_vm1, %v3602_v30, %v394_v40  ;;  %v634_v56 = vmul.f32 %v626_v28, %v451_v11  ;;  %v759_v40 = vmul.f32 %v2117_v1, %v3109_v22  ;;  %v594_v28 = vadd.f32 %v586_v44, %v569_v17  ;;  %v628_v11 = vld [vmem:[#allocation2 + $0x1f0] sm:$0xff]  ;;  %v3611_v44 = vld [vmem:[#allocation19_spill] sm:$0xff] }
 0x102   :  { %v610_v18 = vmul.f32 %v602_v35, %v412_v50  ;;  %v2123_v30 = vpop.f32.mrf.mxu0  ;;  %v3615_v17 = vld [vmem:[#allocation29_spill] sm:$0xff] }
 0x103   :  { %v396_v33 = vpop.permute.xlu1 %395  ;;  %v3116_v57 = vadd.f32 %v634_v56, %v617_v3  ;;  %v766_v0 = vadd.f32 %v765_v60, %v759_v40  ;;  %v3621_v40 = vld [vmem:[#allocation39_spill] sm:$0xff]  ;;  %v932_v60 = vlaneseq }
 0x104   :  { %v358_v47 = vpop.permute.xlu0 %357  ;;  %v413_v36 = vsel %vm166_vm1, %v3605_v51, %v396_v33  ;;  %v618_v2 = vadd.f32 %v610_v18, %v593_v42  ;;  %v747_v33 = vpop.f32.mrf.mxu0  ;;  %v3614_v42 = vld [vmem:[#allocation26_spill] sm:$0xff] }
 0x105   :  { %v374_v49 = vsel %vm166_vm1, %v3604_v32, %v358_v47  ;;  %v611_v39 = vmul.f32 %v603_v52, %v413_v36  ;;  %v760_v45 = vmul.f32 %v737_v27, %v3116_v57  ;;  %v3140_v36 = vld [vmem:[%s3499_s2] sm:$0xff] }
 0x106   :  { %v587_v26 = vmul.f32 %v579_v34, %v374_v49  ;;  %v3620_v27 = vld [vmem:[#allocation38_spill] sm:$0xff] }
 0x107   :  { %v398_v9 = vpop.permute.xlu1 %397  ;;  %v619_v58 = vadd.f32 %v611_v39, %v594_v28  ;;  %v767_v10 = vadd.f32 %v766_v0, %v760_v45  ;;  %v3619_v39 = vld [vmem:[#allocation37_spill] sm:$0xff] }
 0x108   :  { %v434_v4 = vpop.permute.xlu0 %433  ;;  %v414_v37 = vsel %vm166_vm1, %v3606_v53, %v398_v9  ;;  %v595_v21 = vadd.f32 %v587_v26, %v570_v41  ;;  %v3616_v26 = vld [vmem:[#allocation30_spill] sm:$0xff]  ;;  %v3617_v9 = vld [vmem:[#allocation33_spill] sm:$0xff]  ;;  %v3622_v53 = vld [vmem:[#allocation40_spill] sm:$0xff] }
 0x109   :  { %v452_v25 = vsel %vm166_vm1, %v3607_v54, %v434_v4  ;;  %v612_v20 = vmul.f32 %v604_v12, %v414_v37  ;;  %v3612_v12 = vld [vmem:[#allocation22_spill] sm:$0xff]  ;;  %v3618_v4 = vld [vmem:[#allocation36_spill] sm:$0xff]  ;;  %v3623_v37 = vld [vmem:[#allocation41_spill] sm:$0xff] }
 0x10a   :  { %v635_v62 = vmul.f32 %v627_v8, %v452_v25  ;;  %v3613_v8 = vld [vmem:[#allocation23_spill] sm:$0xff]  ;;  %v3624_v54 = vld [vmem:[#allocation42_spill] sm:$0xff]  ;;  %v3626_v41 = vld [vmem:[#allocation44_spill] sm:$0xff] }
 0x10b   :  { %v438_v1 = vpop.permute.xlu1 %437  ;;  %v620_v50 = vadd.f32 %v612_v20, %v595_v21  ;;  %v3625_v25 = vld [vmem:[#allocation43_spill] sm:$0xff] }
 0x10c   :  { %v3124_v23 = vadd.f32 %v635_v62, %v618_v2  ;;  %v436_v15 = vpop.permute.xlu0 %435  ;;  %v454_v43 = vsel %vm166_vm1, %v3608_v7, %v438_v1 }
 0x10d   :  { %v453_v35 = vsel %vm166_vm1, %v3609_v13, %v436_v15  ;;  %v637_v16 = vmul.f32 %v629_v29, %v454_v43 }
 0x10e   :  { %v636_v55 = vmul.f32 %v628_v11, %v453_v35  ;;  %v761_v59 = vmul.f32 %v2120_v6, %v3124_v23  ;;  %v3177_v11 = vshrl.u32 %v932_v60, 7 }
 0x10f   :  { %v3131_v38 = vadd.f32 %v637_v16, %v620_v50 }
 0x110   :  { %v3133_v56 = vadd.f32 %v636_v55, %v619_v58  ;;  %v768_v63 = vadd.f32 %v767_v10, %v761_v59  ;;  %v934_v58 = vsub.s32 0, %v3177_v11 }
 0x111   :  { %v763_v48 = vmul.f32 %v2123_v30, %v3131_v38 }
 0x112   :  { %v762_v47 = vmul.f32 %v747_v33, %v3133_v56 }
 0x114   :  { %v769_v34 = vadd.f32 %v768_v63, %v762_v47 }
 0x116   :  { %v770_v32 = vadd.f32 %v769_v34, %v763_v48 }
 0x118   :  { %v771_v49 = vrot.slane %v770_v32, 4 }
 0x11a   :  { %v772_v3 = vadd.f32 %v771_v49, %v770_v32 }
 0x11c   :  { %v773_v46 = vrot.slane %v772_v3, 2 }
 0x11e   :  { %v774_v18 = vadd.f32 %v773_v46, %v772_v3 }
 0x120   :  { %v775_v52 = vrot.slane %v774_v18, 1 }
 0x122   :  { %v776_v51 = vadd.f32 %v775_v52, %v774_v18 }
 0x124   :  { %v777_v6 = vmul.f32 %v776_v51, %v776_v51 }
 0x126   :  { %2157 = vmatmul.mubr.f32.vlgmr.msra.gmra.mxu1 %v777_v6 }
 0x127   :  { %2209 = vmatpush3.msra.mxu1 %v3140_v36 }
 0x128   :  { %2222 = vmatprep.subr.mxu1 %v3610_v14 }
 0x1e6   :  { %v844_v24 = vpop.f32.mrf.mxu1 }
 0x1e7   :  { %2162 = vmatmul.mubr.msk.f32.vlgmr.msra.gmra.mxu0 %vm647_vm0, %v844_v24 }
 0x1e8   :  { %v2158_v19 = vpop.f32.mrf.mxu1  ;;  %2165 = vmatpush3.msra.mxu0 %v3611_v44 }
 0x1e9   :  { %2166 = vmatprep.subr.mxu0 %v3612_v12 }
 0x1ea   :  { %2167 = vmatpush3.msra.mxu0 %v3612_v12 }
 0x1eb   :  { %2168 = vmatprep.subr.mxu0 %v3613_v8 }
 0x1ec   :  { %2169 = vmatpush3.msra.mxu0 %v3613_v8 }
 0x1ed   :  { %2170 = vmatprep.subr.mxu0 %v3614_v42 }
 0x1ee   :  { %2171 = vmatpush3.msra.mxu0 %v3614_v42 }
 0x1ef   :  { %2172 = vmatprep.subr.mxu0 %v3615_v17 }
 0x1f0   :  { %2173 = vmatpush3.msra.mxu0 %v3615_v17 }
 0x1f1   :  { %2174 = vmatprep.subr.mxu0 %v3616_v26 }
 0x1f2   :  { %2175 = vmatpush3.msra.mxu0 %v3616_v26 }
 0x1f3   :  { %2176 = vmatprep.subr.mxu0 %v3617_v9 }
 0x1f4   :  { %2177 = vmatpush3.msra.mxu0 %v3617_v9 }
 0x1f5   :  { %2178 = vmatprep.subr.mxu0 %v3618_v4 }
 0x1f6   :  { %2179 = vmatpush3.msra.mxu0 %v3618_v4 }
 0x1f7   :  { %2180 = vmatprep.subr.mxu0 %v3619_v39 }
 0x1f8   :  { %2181 = vmatpush3.msra.mxu0 %v3619_v39 }
 0x1f9   :  { %2182 = vmatprep.subr.mxu0 %v3620_v27 }
 0x1fa   :  { %2183 = vmatpush3.msra.mxu0 %v3620_v27 }
 0x1fb   :  { %2184 = vmatprep.subr.mxu0 %v3621_v40 }
 0x1fc   :  { %2185 = vmatpush3.msra.mxu0 %v3621_v40 }
 0x1fd   :  { %2186 = vmatprep.subr.mxu0 %v3622_v53 }
 0x1fe   :  { %2187 = vmatpush3.msra.mxu0 %v3622_v53 }
 0x1ff   :  { %2188 = vmatprep.subr.mxu0 %v3623_v37 }
 0x200   :  { %2189 = vmatpush3.msra.mxu0 %v3623_v37 }
 0x201   :  { %2190 = vmatprep.subr.mxu0 %v3624_v54 }
 0x202   :  { %2191 = vmatpush3.msra.mxu0 %v3624_v54 }
 0x203   :  { %2192 = vmatprep.subr.mxu0 %v3625_v25 }
 0x204   :  { %2193 = vmatpush3.msra.mxu0 %v3625_v25 }
 0x205   :  { %2194 = vmatprep.subr.mxu0 %v3626_v41 }
 0x206   :  { %2195 = vmatpush3.msra.mxu0 %v3626_v41 }
 0x207   :  { %2257 = vmatprep.subr.mxu0 %v3610_v14 }
 0x2a7   :  { %v917_v2 = vpop.f32.mrf.mxu0 }
 0x2a8   :  { %2369 = vrsqrt.f32 %v917_v2  ;;  %v929_v62 = vadd.f32 1.0, %v917_v2  ;;  %vm923_vm3 = vcmp.eq.f32.partialorder %v917_v2, inf  ;;  %v926_v21 = vand.u32 2147483648, %v917_v2 }
 0x2a9   :  { %v2163_v20 = vpop.f32.mrf.mxu0  ;;  %vm925_vm4 = vcmp.eq.f32.partialorder %v917_v2, 0.0 }
 0x2aa   :  { %2371 = vrcp.f32 %v929_v62 }
 0x2b5   :  { %v2370_v28 = vpop.eup %2369 }
 0x2b6   :  { %v922_v29 = vmul.f32 %v2370_v28, %v917_v2 }
 0x2b7   :  { %v2372_v0 = vpop.eup %2371 }
 0x2b8   :  { %v924_v45 = vsel %vm923_vm3, %v917_v2, %v922_v29 }
 0x2b9   :  { %v927_v1 = vsel %vm925_vm4, %v926_v21, %v924_v45 }
 0x2ba   :  { %v928_v15 = vmul.f32 %v927_v1, %v776_v51 }
 0x2bc   :  { %v931_v7 = vmul.f32 %v2372_v0, %v928_v15 }
 0x2be   :  { %v935_v43 = vrot.slane %v931_v7, %v934_v58 }
 0x2c0   :  { %v936_v13 = vmul.f32 %v935_v43, %v3064_v5  ;;  %v937_v35 = vmul.f32 %v935_v43, %v3081_v61  ;;  %v938_v30 = vmul.f32 %v935_v43, %v3101_v31  ;;  %v939_v50 = vmul.f32 %v935_v43, %v3109_v22 }
 0x2c1   :  { %v940_v16 = vmul.f32 %v935_v43, %v3116_v57  ;;  %v941_v55 = vmul.f32 %v935_v43, %v3124_v23  ;;  %v942_v59 = vmul.f32 %v935_v43, %v3133_v56  ;;  %v943_v10 = vmul.f32 %v935_v43, %v3131_v38 }
 0x2c2   :  { %2196 = vmatprep.mubr.f32.mxu0 %v936_v13 }
 0x2c3   :  { %2197 = vmatmul.mubr.f32.vlgmr.msra.gmra.mxu0 %v937_v35 }
 0x2c4   :  { %2199 = vmatprep.mubr.f32.mxu0 %v938_v30  ;;  %2258 = vmatpush3.msra.mxu0 %v3140_v36 }
 0x2c5   :  { %2262 = vmatprep.subr.mxu0 %v3611_v44 }
 0x2c7   :  { %2200 = vmatmul.mubr.f32.gmra.mxu0 %v939_v50 }
 0x2c8   :  { %2202 = vmatprep.mubr.f32.mxu0 %v940_v16 }
 0x2cb   :  { %2203 = vmatmul.mubr.f32.gmra.mxu0 %v941_v55 }
 0x2cc   :  { %2205 = vmatprep.mubr.f32.mxu0 %v942_v59 }
 0x2cf   :  { %2206 = vmatmul.mubr.f32.gmra.mxu0 %v943_v10 }
 0x2d0   :  { %2259 = vmatprep.mubr.msk.f32.mxu0 %vm2507_vm2, %v3610_v14 }
 0x383   :  { %v3194_v33 = vpop.f32.mrf.mxu0 }
 0x384   :  { %v1050_v24 = vsel %vm647_vm0, %v3194_v33, -inf }
 0x385   :  { %v3196_v47 = vpop.f32.mrf.mxu0 }
 0x386   :  { %v1049_v46 = vsel %vm647_vm0, %v3196_v47, -inf }
 0x387   :  { %v3198_v63 = vpop.f32.mrf.mxu0 }
 0x388   :  { %v1052_v19 = vsel %vm647_vm0, %v3198_v63, -inf }
 0x389   :  { %v3200_v48 = vpop.f32.mrf.mxu0 }
 0x38a   :  { %v1051_v44 = vsel %vm647_vm0, %v3200_v48, -inf }
 0x38b   :  { %v3202_v34 = vpop.f32.mrf.mxu0 }
 0x38c   :  { %v1055_v18 = vsel %vm647_vm0, %v3202_v34, -inf }
 0x38d   :  { %v3204_v32 = vpop.f32.mrf.mxu0  ;;  %v1056_v8 = vmax.f32 %v1050_v24, %v1055_v18 }
 0x38e   :  { %v1053_v49 = vsel %vm647_vm0, %v3204_v32, -inf }
 0x38f   :  { %v3208_v3 = vpop.f32.mrf.mxu0  ;;  %v1054_v51 = vmax.f32 %v1049_v46, %v1053_v49 }
 0x390   :  { %v1059_v52 = vsel %vm647_vm0, %v3208_v3, -inf }
 0x391   :  { %v3216_v6 = vpop.f32.mrf.mxu0  ;;  %v1060_v42 = vmax.f32 %v1052_v19, %v1059_v52  ;;  %v1061_v26 = vmax.f32 %v1054_v51, %v1056_v8 }
 0x392   :  { %v1057_v12 = vsel %vm647_vm0, %v3216_v6, -inf }
 0x393   :  { %v1058_v17 = vmax.f32 %v1051_v44, %v1057_v12 }
 0x395   :  { %v1062_v9 = vmax.f32 %v1058_v17, %v1060_v42 }
 0x397   :  { %v1063_v4 = vmax.f32 %v1061_v26, %v1062_v9 }
 0x399   :  { %v1064_v39 = vrot.slane %v1063_v4, 4 }
 0x39b   :  { %v1065_v27 = vmax.f32 %v1063_v4, %v1064_v39 }
 0x39d   :  { %v1066_v40 = vrot.slane %v1065_v27, 2 }
 0x39f   :  { %v1067_v53 = vmax.f32 %v1065_v27, %v1066_v40 }
 0x3a1   :  { %v1068_v37 = vrot.slane %v1067_v53, 1 }
 0x3a3   :  { %v1069_v2 = vmax.f32 %v1067_v53, %v1068_v37 }
 0x3a5   :  { %v1070_v20 = vsub.f32 %v3196_v47, %v1069_v2  ;;  %v1071_v62 = vsub.f32 %v3194_v33, %v1069_v2  ;;  %v1072_v60 = vsub.f32 %v3200_v48, %v1069_v2  ;;  %v1073_v28 = vsub.f32 %v3198_v63, %v1069_v2 }
 0x3a6   :  { %v1074_v29 = vsub.f32 %v3204_v32, %v1069_v2  ;;  %v1075_v15 = vsub.f32 %v3202_v34, %v1069_v2  ;;  %v1076_v7 = vsub.f32 %v3216_v6, %v1069_v2  ;;  %v1077_v13 = vsub.f32 %v3208_v3, %v1069_v2 }
 0x3a7   :  { %v1078_v21 = vmul.f32 1.442695, %v1070_v20  ;;  %v1080_v45 = vmul.f32 1.442695, %v1071_v62  ;;  %v1082_v1 = vmul.f32 1.442695, %v1072_v60 }
 0x3a8   :  { %v1084_v0 = vmul.f32 1.442695, %v1073_v28  ;;  %v1086_v43 = vmul.f32 1.442695, %v1074_v29  ;;  %v1088_v35 = vmul.f32 1.442695, %v1075_v15 }
 0x3a9   :  { %2373 = vpow2.f32 %v1078_v21  ;;  %v1090_v30 = vmul.f32 1.442695, %v1076_v7  ;;  %v1092_v50 = vmul.f32 1.442695, %v1077_v13  ;;  %v3248_v15 = vld [vmem:[%s3500_s3 + $0x78] sm:$0xff]  ;;  %v3264_v13 = vld [vmem:[%s3500_s3 + $0x68] sm:$0xff] }
 0x3aa   :  { %2375 = vpow2.f32 %v1080_v45 }
 0x3ab   :  { %2377 = vpow2.f32 %v1082_v1 }
 0x3ac   :  { %2379 = vpow2.f32 %v1084_v0 }
 0x3ad   :  { %2381 = vpow2.f32 %v1086_v43  ;;  %v3255_v43 = vld [vmem:[%s3500_s3 + $0x70] sm:$0xff] }
 0x3ae   :  { %2383 = vpow2.f32 %v1088_v35 }
 0x3af   :  { %2385 = vpow2.f32 %v1090_v30 }
 0x3b0   :  { %2387 = vpow2.f32 %v1092_v50  ;;  %v3271_v50 = vld [vmem:[%s3500_s3 + $0x60] sm:$0xff] }
 0x3b6   :  { %v2374_v16 = vpop.eup %2373 }
 0x3b7   :  { %v2376_v55 = vpop.eup %2375  ;;  %v1094_v59 = vsel %vm647_vm0, %v2374_v16, 0.0 }
 0x3b8   :  { %v2378_v10 = vpop.eup %2377  ;;  %v1095_v49 = vsel %vm647_vm0, %v2376_v55, 0.0 }
 0x3b9   :  { %v2380_v46 = vpop.eup %2379  ;;  %v1096_v18 = vadd.f32 %v1095_v49, %v1094_v59  ;;  %v1097_v52 = vsel %vm647_vm0, %v2378_v10, 0.0  ;;  %v3287_v59 = vld [vmem:[%s3500_s3 + $0x50] sm:$0xff]  ;;  %v3304_v49 = vld [vmem:[%s3500_s3 + $0x40] sm:$0xff] }
 0x3ba   :  { %v2382_v51 = vpop.eup %2381  ;;  %v1099_v19 = vsel %vm647_vm0, %v2380_v46, 0.0 }
 0x3bb   :  { %v1098_v24 = vadd.f32 %v1097_v52, %v1096_v18  ;;  %v2384_v44 = vpop.eup %2383  ;;  %v1101_v8 = vsel %vm647_vm0, %v2382_v51, 0.0  ;;  %v3318_v18 = vld [vmem:[%s3500_s3 + $0x30] sm:$0xff]  ;;  %v3325_v52 = vld [vmem:[%s3500_s3 + $0x28] sm:$0xff] }
 0x3bc   :  { %v2386_v42 = vpop.eup %2385  ;;  %v1103_v26 = vsel %vm647_vm0, %v2384_v44, 0.0 }
 0x3bd   :  { %v1100_v12 = vadd.f32 %v1099_v19, %v1098_v24  ;;  %v2388_v9 = vpop.eup %2387  ;;  %v1105_v39 = vsel %vm647_vm0, %v2386_v42, 0.0  ;;  %v3339_v24 = vld [vmem:[%s3500_s3 + $0x18] sm:$0xff] }
 0x3be   :  { %v1107_v40 = vsel %vm647_vm0, %v2388_v9, 0.0 }
 0x3bf   :  { %v1102_v17 = vadd.f32 %v1101_v8, %v1100_v12 }
 0x3c1   :  { %v1104_v4 = vadd.f32 %v1103_v26, %v1102_v17 }
 0x3c3   :  { %v1106_v27 = vadd.f32 %v1105_v39, %v1104_v4 }
 0x3c5   :  { %v1108_v53 = vadd.f32 %v1107_v40, %v1106_v27 }
 0x3c7   :  { %v1109_v37 = vrot.slane %v1108_v53, 4 }
 0x3c9   :  { %v1110_v2 = vadd.f32 %v1109_v37, %v1108_v53 }
 0x3cb   :  { %v1111_v20 = vrot.slane %v1110_v2, 2 }
 0x3cd   :  { %v1112_v62 = vadd.f32 %v1111_v20, %v1110_v2 }
 0x3cf   :  { %v1113_v60 = vrot.slane %v1112_v62, 1 }
 0x3d1   :  { %v1114_v28 = vadd.f32 %v1113_v60, %v1112_v62 }
 0x3d3   :  { %2389 = vrcp.f32 %v1114_v28 }
 0x3e0   :  { %v2390_v29 = vpop.eup %2389 }
 0x3e1   :  { %v1116_v21 = vmul.f32 %v2390_v29, %v2374_v16  ;;  %v1117_v45 = vmul.f32 %v2390_v29, %v2376_v55  ;;  %v1118_v1 = vmul.f32 %v2390_v29, %v2378_v10  ;;  %v1119_v0 = vmul.f32 %v2390_v29, %v2380_v46  ;;  %v3280_v16 = vld [vmem:[%s3500_s3 + $0x58] sm:$0xff]  ;;  %v3295_v10 = vld [vmem:[%s3500_s3 + $0x48] sm:$0xff] }
 0x3e2   :  { %v1120_v7 = vmul.f32 %v2390_v29, %v2382_v51  ;;  %v1121_v35 = vmul.f32 %v2390_v29, %v2384_v44  ;;  %v1122_v30 = vmul.f32 %v2390_v29, %v2386_v42  ;;  %v1123_v55 = vmul.f32 %v2390_v29, %v2388_v9  ;;  %v3311_v46 = vld [vmem:[%s3500_s3 + $0x38] sm:$0xff]  ;;  %v3332_v51 = vld [vmem:[%s3500_s3 + $0x20] sm:$0xff] }
 0x3e3   :  { %2210 = vmatprep.mubr.msk.f32.mxu1 %vm647_vm0, %v1116_v21 }
 0x3e4   :  { %2211 = vmatmul.mubr.msk.f32.vlgmr.msra.gmra.mxu1 %vm647_vm0, %v1117_v45 }
 0x3e5   :  { %2213 = vmatprep.mubr.msk.f32.mxu1 %vm647_vm0, %v1118_v1  ;;  %2223 = vmatpush3.msra.mxu1 %v3248_v15 }
 0x3e6   :  { %2224 = vmatprep.subr.mxu1 %v3610_v14 }
 0x3e7   :  { %2225 = vmatpush3.msra.mxu1 %v3255_v43 }
 0x3e8   :  { %2214 = vmatmul.mubr.msk.f32.gmra.mxu1 %vm647_vm0, %v1119_v0  ;;  %2226 = vmatprep.subr.mxu1 %v3610_v14 }
 0x3e9   :  { %2216 = vmatprep.mubr.msk.f32.mxu1 %vm647_vm0, %v1120_v7  ;;  %2227 = vmatpush3.msra.mxu1 %v3264_v13 }
 0x3ea   :  { %2228 = vmatprep.subr.mxu1 %v3610_v14 }
 0x3eb   :  { %2229 = vmatpush3.msra.mxu1 %v3271_v50 }
 0x3ec   :  { %2217 = vmatmul.mubr.msk.f32.gmra.mxu1 %vm647_vm0, %v1121_v35  ;;  %2230 = vmatprep.subr.mxu1 %v3610_v14 }
 0x3ed   :  { %2219 = vmatprep.mubr.msk.f32.mxu1 %vm647_vm0, %v1122_v30  ;;  %2231 = vmatpush3.msra.mxu1 %v3280_v16 }
 0x3ee   :  { %2232 = vmatprep.subr.mxu1 %v3610_v14 }
 0x3ef   :  { %2233 = vmatpush3.msra.mxu1 %v3287_v59 }
 0x3f0   :  { %2220 = vmatmul.mubr.msk.f32.gmra.mxu1 %vm647_vm0, %v1123_v55  ;;  %2234 = vmatprep.subr.mxu1 %v3610_v14 }
 0x3f1   :  { %2235 = vmatpush3.msra.mxu1 %v3295_v10  ;;  %2254 = vmatprep.mubr.msk.f32.mxu1 %vm2507_vm2, %v3610_v14 }
 0x3f2   :  { %2236 = vmatprep.subr.mxu1 %v3610_v14 }
 0x3f3   :  { %2237 = vmatpush3.msra.mxu1 %v3304_v49 }
 0x3f4   :  { %2238 = vmatprep.subr.mxu1 %v3610_v14 }
 0x3f5   :  { %2239 = vmatpush3.msra.mxu1 %v3311_v46 }
 0x3f6   :  { %2240 = vmatprep.subr.mxu1 %v3610_v14 }
 0x3f7   :  { %2241 = vmatpush3.msra.mxu1 %v3318_v18 }
 0x3f8   :  { %2242 = vmatprep.subr.mxu1 %v3610_v14 }
 0x3f9   :  { %2243 = vmatpush3.msra.mxu1 %v3325_v52 }
 0x3fa   :  { %2244 = vmatprep.subr.mxu1 %v3610_v14 }
 0x3fb   :  { %2245 = vmatpush3.msra.mxu1 %v3332_v51 }
 0x3fc   :  { %2246 = vmatprep.subr.mxu1 %v3610_v14 }
 0x3fd   :  { %2247 = vmatpush3.msra.mxu1 %v3339_v24 }
 0x3fe   :  { %2248 = vmatprep.subr.mxu1 %v3610_v14 }
 0x3ff   :  { %2249 = vmatpush3.msra.mxu1 %v3624_v54 }
 0x400   :  { %2250 = vmatprep.subr.mxu1 %v3610_v14 }
 0x401   :  { %2251 = vmatpush3.msra.mxu1 %v3625_v25 }
 0x402   :  { %2252 = vmatprep.subr.mxu1 %v3610_v14 }
 0x403   :  { %2253 = vmatpush3.msra.mxu1 %v3626_v41 }
 0x404   :  { %2306 = vmatprep.subr.mxu1 %v3140_v36 }
 0x4a4   :  { %v2212_v19 = vpop.f32.mrf.mxu1 }
 0x4a5   :  { %v1254_v42 = vmul.f32 %v2212_v19, %v3081_v61 }
 0x4a6   :  { %v1214_v44 = vpop.f32.mrf.mxu1 }
 0x4a7   :  { %v1253_v12 = vmul.f32 %v1214_v44, %v3064_v5  ;;  %v3388_v44 = vld [vmem:[%s3500_s3 + $0x10] sm:$0xff] }
 0x4a8   :  { %v2215_v8 = vpop.f32.mrf.mxu1 }
 0x4a9   :  { %v1261_v26 = vadd.f32 %v1254_v42, %v1253_v12  ;;  %v1256_v25 = vmul.f32 %v2215_v8, %v3109_v22  ;;  %v3395_v12 = vld [vmem:[%s3500_s3 + $0x8] sm:$0xff]  ;;  %v3402_v8 = vld [vmem:[%s3500_s3] sm:$0xff]  ;;  %s2508_s3 = smov [#allocation7]  }
 0x4aa   :  { %v1224_v17 = vpop.f32.mrf.mxu1  ;;  %s1941_s10 = sshll.u32 %s2508_s3, 4  ;;  %s1942_s10 = int_to_ptr.vmem [resolvable:$true] %s1941_s10 }
 0x4ab   :  { %v1255_v54 = vmul.f32 %v1224_v17, %v3101_v31  ;;  %s2474_s11 = scalar_lea.vmem %s1942_s10, 16  ;;  %s2478_s12 = scalar_lea.vmem %s1942_s10, 32 }
 0x4ac   :  { %v2218_v9 = vpop.f32.mrf.mxu1  ;;  %p2475_p10 = scmp.ne.s32.totalorder %s1942_s10, %s2474_s11  ;;  %p2479_p11 = scmp.lt.s32.totalorder %s1942_s10, %s1942_s10 }
 0x4ad   :  { %v1262_v4 = vadd.f32 %v1261_v26, %v1255_v54  ;;  %v1258_v53 = vmul.f32 %v2218_v9, %v3124_v23  ;;  %p2480_p12 = scmp.lt.s32.totalorder %s2478_s12, %s2474_s11 }
 0x4ae   :  { %v1234_v39 = vpop.f32.mrf.mxu1 }
 0x4af   :  { %v1257_v41 = vmul.f32 %v1234_v39, %v3116_v57  ;;  %v1263_v27 = vadd.f32 %v1262_v4, %v1256_v25  ;;  %p2481_p13 = por %p2480_p12, %p2479_p11 }
 0x4b0   :  { %v2221_v40 = vpop.f32.mrf.mxu1 }
 0x4b1   :  { %v1264_v37 = vadd.f32 %v1263_v27, %v1257_v41  ;;  %v1260_v60 = vmul.f32 %v2221_v40, %v3131_v38  ;;  %p2482_p0 = pnand %p2481_p13, %p2475_p10 }
 0x4b2   :  { %v1244_v2 = vpop.f32.mrf.mxu1 }
 0x4b3   :  { %v1259_v20 = vmul.f32 %v1244_v2, %v3133_v56  ;;  %v1265_v62 = vadd.f32 %v1264_v37, %v1258_v53 }
 0x4b5   :  { %v1266_v28 = vadd.f32 %v1265_v62, %v1259_v20 }
 0x4b7   :  { %v1267_v29 = vadd.f32 %v1266_v28, %v1260_v60 }
 0x4b9   :  { %v1268_v21 = vrot.slane %v1267_v29, 4 }
 0x4bb   :  { %v1269_v45 = vadd.f32 %v1268_v21, %v1267_v29 }
 0x4bd   :  { %v1270_v1 = vrot.slane %v1269_v45, 2 }
 0x4bf   :  { %v1271_v0 = vadd.f32 %v1270_v1, %v1269_v45 }
 0x4c1   :  { %v1272_v7 = vrot.slane %v1271_v0, 1 }
 0x4c3   :  { %v1273_v35 = vadd.f32 %v1272_v7, %v1271_v0 }
 0x4c5   :  { %v1274_v30 = vmul.f32 %v1273_v35, %v1273_v35 }
 0x4c7   :  { %2255 = vmatmul.mubr.f32.vlgmr.msra.gmra.mxu1 %v1274_v30 }
 0x4c8   :  { %2307 = vmatpush3.msra.mxu1 %v3140_v36 }
 0x4c9   :  { %2320 = vmatprep.subr.mxu1 %v3610_v14 }
 0x587   :  { %v1341_v55 = vpop.f32.mrf.mxu1 }
 0x588   :  { %2260 = vmatmul.mubr.msk.f32.vlgmr.msra.gmra.mxu0 %vm647_vm0, %v1341_v55 }
 0x589   :  { %v2256_v19 = vpop.f32.mrf.mxu1  ;;  %2263 = vmatpush3.msra.mxu0 %v3248_v15 }
 0x58a   :  { %2264 = vmatprep.subr.mxu0 %v3255_v43 }
 0x58b   :  { %2265 = vmatpush3.msra.mxu0 %v3255_v43 }
 0x58c   :  { %2266 = vmatprep.subr.mxu0 %v3264_v13 }
 0x58d   :  { %2267 = vmatpush3.msra.mxu0 %v3264_v13 }
 0x58e   :  { %2268 = vmatprep.subr.mxu0 %v3271_v50 }
 0x58f   :  { %2269 = vmatpush3.msra.mxu0 %v3271_v50 }
 0x590   :  { %2270 = vmatprep.subr.mxu0 %v3280_v16 }
 0x591   :  { %2271 = vmatpush3.msra.mxu0 %v3280_v16 }
 0x592   :  { %2272 = vmatprep.subr.mxu0 %v3287_v59 }
 0x593   :  { %2273 = vmatpush3.msra.mxu0 %v3287_v59 }
 0x594   :  { %2274 = vmatprep.subr.mxu0 %v3295_v10 }
 0x595   :  { %2275 = vmatpush3.msra.mxu0 %v3295_v10 }
 0x596   :  { %2276 = vmatprep.subr.mxu0 %v3304_v49 }
 0x597   :  { %2277 = vmatpush3.msra.mxu0 %v3304_v49 }
 0x598   :  { %2278 = vmatprep.subr.mxu0 %v3311_v46 }
 0x599   :  { %2279 = vmatpush3.msra.mxu0 %v3311_v46 }
 0x59a   :  { %2280 = vmatprep.subr.mxu0 %v3318_v18 }
 0x59b   :  { %2281 = vmatpush3.msra.mxu0 %v3318_v18 }
 0x59c   :  { %2282 = vmatprep.subr.mxu0 %v3325_v52 }
 0x59d   :  { %2283 = vmatpush3.msra.mxu0 %v3325_v52 }
 0x59e   :  { %2284 = vmatprep.subr.mxu0 %v3332_v51 }
 0x59f   :  { %2285 = vmatpush3.msra.mxu0 %v3332_v51 }
 0x5a0   :  { %2286 = vmatprep.subr.mxu0 %v3339_v24 }
 0x5a1   :  { %2287 = vmatpush3.msra.mxu0 %v3339_v24 }
 0x5a2   :  { %2288 = vmatprep.subr.mxu0 %v3388_v44 }
 0x5a3   :  { %2289 = vmatpush3.msra.mxu0 %v3388_v44 }
 0x5a4   :  { %2290 = vmatprep.subr.mxu0 %v3395_v12 }
 0x5a5   :  { %2291 = vmatpush3.msra.mxu0 %v3395_v12 }
 0x5a6   :  { %2292 = vmatprep.subr.mxu0 %v3402_v8 }
 0x5a7   :  { %2293 = vmatpush3.msra.mxu0 %v3402_v8 }
 0x648   :  { %v1414_v42 = vpop.f32.mrf.mxu0 }
 0x649   :  { %2391 = vrsqrt.f32 %v1414_v42  ;;  %v1426_v26 = vadd.f32 1.0, %v1414_v42  ;;  %vm1420_vm5 = vcmp.eq.f32.partialorder %v1414_v42, inf  ;;  %v1423_v25 = vand.u32 2147483648, %v1414_v42 }
 0x64a   :  { %v2261_v17 = vpop.f32.mrf.mxu0  ;;  %vm1422_vm6 = vcmp.eq.f32.partialorder %v1414_v42, 0.0 }
 0x64b   :  { %2393 = vrcp.f32 %v1426_v26 }
 0x656   :  { %v2392_v54 = vpop.eup %2391 }
 0x657   :  { %v1419_v9 = vmul.f32 %v2392_v54, %v1414_v42 }
 0x658   :  { %v2394_v27 = vpop.eup %2393 }
 0x659   :  { %v1421_v4 = vsel %vm1420_vm5, %v1414_v42, %v1419_v9 }
 0x65a   :  { %v1424_v39 = vsel %vm1422_vm6, %v1423_v25, %v1421_v4 }
 0x65b   :  { %v1425_v41 = vmul.f32 %v1424_v39, %v1273_v35 }
 0x65d   :  { %v1428_v40 = vmul.f32 %v2394_v27, %v1425_v41 }
 0x65f   :  { %v1432_v53 = vrot.slane %v1428_v40, %v934_v58 }
 0x661   :  { %v1433_v37 = vmul.f32 %v1432_v53, %v3064_v5  ;;  %v1434_v2 = vmul.f32 %v1432_v53, %v3081_v61  ;;  %v1435_v20 = vmul.f32 %v1432_v53, %v3101_v31  ;;  %v1436_v62 = vmul.f32 %v1432_v53, %v3109_v22 }
 0x662   :  { %v1437_v60 = vmul.f32 %v1432_v53, %v3116_v57  ;;  %v1438_v28 = vmul.f32 %v1432_v53, %v3124_v23  ;;  %v1439_v11 = vmul.f32 %v1432_v53, %v3133_v56  ;;  %v1440_v58 = vmul.f32 %v1432_v53, %v3131_v38 }
 0x663   :  { %2294 = vmatprep.mubr.f32.mxu0 %v1433_v37 }
 0x664   :  { %2295 = vmatmul.mubr.f32.vlgmr.msra.gmra.mxu0 %v1434_v2 }
 0x665   :  { %2297 = vmatprep.mubr.f32.mxu0 %v1435_v20 }
 0x668   :  { %2298 = vmatmul.mubr.f32.gmra.mxu0 %v1436_v62 }
 0x669   :  { %2300 = vmatprep.mubr.f32.mxu0 %v1437_v60 }
 0x66c   :  { %2301 = vmatmul.mubr.f32.gmra.mxu0 %v1438_v28 }
 0x66d   :  { %2303 = vmatprep.mubr.f32.mxu0 %v1439_v11 }
 0x670   :  { %2304 = vmatmul.mubr.f32.gmra.mxu0 %v1440_v58 }
 0x724   :  { %v2296_v29 = vpop.f32.mrf.mxu0 }
 0x725   :  { %v1547_v19 = vadd.f32 %v2296_v29, %v3194_v33 }
 0x726   :  { %v1507_v21 = vpop.f32.mrf.mxu0 }
 0x727   :  { %v1546_v35 = vadd.f32 %v1507_v21, %v3196_v47  ;;  %v1555_v33 = vsel %vm647_vm0, %v1547_v19, -inf }
 0x728   :  { %v2299_v45 = vpop.f32.mrf.mxu0 }
 0x729   :  { %v1549_v17 = vadd.f32 %v2299_v45, %v3198_v63  ;;  %v1554_v4 = vsel %vm647_vm0, %v1546_v35, -inf }
 0x72a   :  { %v1517_v1 = vpop.f32.mrf.mxu0 }
 0x72b   :  { %v1548_v26 = vadd.f32 %v1517_v1, %v3200_v48  ;;  %v1557_v63 = vsel %vm647_vm0, %v1549_v17, -inf }
 0x72c   :  { %v2302_v0 = vpop.f32.mrf.mxu0 }
 0x72d   :  { %v1551_v30 = vadd.f32 %v2302_v0, %v3202_v34  ;;  %v1556_v48 = vsel %vm647_vm0, %v1548_v26, -inf }
 0x72e   :  { %v1527_v7 = vpop.f32.mrf.mxu0 }
 0x72f   :  { %v1550_v55 = vadd.f32 %v1527_v7, %v3204_v32  ;;  %v1560_v47 = vsel %vm647_vm0, %v1551_v30, -inf }
 0x730   :  { %v2305_v42 = vpop.f32.mrf.mxu0  ;;  %v1561_v27 = vmax.f32 %v1555_v33, %v1560_v47 }
 0x731   :  { %v1558_v54 = vsel %vm647_vm0, %v1550_v55, -inf  ;;  %v1553_v9 = vadd.f32 %v2305_v42, %v3208_v3 }
 0x732   :  { %v1537_v25 = vpop.f32.mrf.mxu0  ;;  %v1559_v39 = vmax.f32 %v1554_v4, %v1558_v54 }
 0x733   :  { %v1564_v34 = vsel %vm647_vm0, %v1553_v9, -inf  ;;  %v1552_v32 = vadd.f32 %v1537_v25, %v3216_v6 }
 0x734   :  { %v1565_v3 = vmax.f32 %v1557_v63, %v1564_v34  ;;  %v1566_v53 = vmax.f32 %v1559_v39, %v1561_v27 }
 0x735   :  { %v1562_v41 = vsel %vm647_vm0, %v1552_v32, -inf }
 0x736   :  { %v1563_v40 = vmax.f32 %v1556_v48, %v1562_v41 }
 0x738   :  { %v1567_v37 = vmax.f32 %v1563_v40, %v1565_v3 }
 0x73a   :  { %v1568_v2 = vmax.f32 %v1566_v53, %v1567_v37 }
 0x73c   :  { %v1569_v20 = vrot.slane %v1568_v2, 4 }
 0x73e   :  { %v1570_v62 = vmax.f32 %v1568_v2, %v1569_v20 }
 0x740   :  { %v1571_v60 = vrot.slane %v1570_v62, 2 }
 0x742   :  { %v1572_v28 = vmax.f32 %v1570_v62, %v1571_v60 }
 0x744   :  { %v1573_v6 = vrot.slane %v1572_v28, 1 }
 0x746   :  { %v1574_v11 = vmax.f32 %v1572_v28, %v1573_v6 }
 0x748   :  { %v1575_v58 = vsub.f32 %v1546_v35, %v1574_v11  ;;  %v1576_v29 = vsub.f32 %v1547_v19, %v1574_v11  ;;  %v1577_v21 = vsub.f32 %v1548_v26, %v1574_v11  ;;  %v1578_v45 = vsub.f32 %v1549_v17, %v1574_v11 }
 0x749   :  { %v1579_v1 = vsub.f32 %v1550_v55, %v1574_v11  ;;  %v1580_v54 = vsub.f32 %v1551_v30, %v1574_v11  ;;  %v1581_v4 = vsub.f32 %v1552_v32, %v1574_v11  ;;  %v1582_v34 = vsub.f32 %v1553_v9, %v1574_v11 }
 0x74a   :  { %v1583_v0 = vmul.f32 1.442695, %v1575_v58  ;;  %v1585_v7 = vmul.f32 1.442695, %v1576_v29  ;;  %v1587_v42 = vmul.f32 1.442695, %v1577_v21 }
 0x74b   :  { %v1589_v25 = vmul.f32 1.442695, %v1578_v45  ;;  %v1591_v47 = vmul.f32 1.442695, %v1579_v1  ;;  %v1593_v39 = vmul.f32 1.442695, %v1580_v54 }
 0x74c   :  { %2395 = vpow2.f32 %v1583_v0  ;;  %v1595_v33 = vmul.f32 1.442695, %v1581_v4  ;;  %v1597_v35 = vmul.f32 1.442695, %v1582_v34 }
 0x74d   :  { %2397 = vpow2.f32 %v1585_v7 }
 0x74e   :  { %2399 = vpow2.f32 %v1587_v42 }
 0x74f   :  { %2401 = vpow2.f32 %v1589_v25 }
 0x750   :  { %2403 = vpow2.f32 %v1591_v47 }
 0x751   :  { %2405 = vpow2.f32 %v1593_v39 }
 0x752   :  { %2407 = vpow2.f32 %v1595_v33 }
 0x753   :  { %2409 = vpow2.f32 %v1597_v35 }
 0x759   :  { %v2396_v55 = vpop.eup %2395 }
 0x75a   :  { %v2398_v19 = vpop.eup %2397  ;;  %v1599_v17 = vsel %vm647_vm0, %v2396_v55, 0.0 }
 0x75b   :  { %v2400_v30 = vpop.eup %2399  ;;  %v1600_v26 = vsel %vm647_vm0, %v2398_v19, 0.0 }
 0x75c   :  { %v2402_v32 = vpop.eup %2401  ;;  %v1601_v63 = vadd.f32 %v1600_v26, %v1599_v17  ;;  %v1602_v48 = vsel %vm647_vm0, %v2400_v30, 0.0 }
 0x75d   :  { %v2404_v9 = vpop.eup %2403  ;;  %v1604_v27 = vsel %vm647_vm0, %v2402_v32, 0.0 }
 0x75e   :  { %v1603_v41 = vadd.f32 %v1602_v48, %v1601_v63  ;;  %v2406_v3 = vpop.eup %2405  ;;  %v1606_v53 = vsel %vm647_vm0, %v2404_v9, 0.0 }
 0x75f   :  { %v2408_v37 = vpop.eup %2407  ;;  %v1608_v20 = vsel %vm647_vm0, %v2406_v3, 0.0 }
 0x760   :  { %v1605_v40 = vadd.f32 %v1604_v27, %v1603_v41  ;;  %v2410_v62 = vpop.eup %2409  ;;  %v1610_v28 = vsel %vm647_vm0, %v2408_v37, 0.0 }
 0x761   :  { %v1612_v11 = vsel %vm647_vm0, %v2410_v62, 0.0 }
 0x762   :  { %v1607_v2 = vadd.f32 %v1606_v53, %v1605_v40 }
 0x764   :  { %v1609_v60 = vadd.f32 %v1608_v20, %v1607_v2 }
 0x766   :  { %v1611_v6 = vadd.f32 %v1610_v28, %v1609_v60 }
 0x768   :  { %v1613_v58 = vadd.f32 %v1612_v11, %v1611_v6 }
 0x76a   :  { %v1614_v29 = vrot.slane %v1613_v58, 4 }
 0x76c   :  { %v1615_v21 = vadd.f32 %v1614_v29, %v1613_v58 }
 0x76e   :  { %v1616_v45 = vrot.slane %v1615_v21, 2 }
 0x770   :  { %v1617_v1 = vadd.f32 %v1616_v45, %v1615_v21 }
 0x772   :  { %v1618_v0 = vrot.slane %v1617_v1, 1 }
 0x774   :  { %v1619_v7 = vadd.f32 %v1618_v0, %v1617_v1 }
 0x776   :  { %2411 = vrcp.f32 %v1619_v7 }
 0x783   :  { %v2412_v42 = vpop.eup %2411 }
 0x784   :  { %v1621_v54 = vmul.f32 %v2412_v42, %v2396_v55  ;;  %v1622_v25 = vmul.f32 %v2412_v42, %v2398_v19  ;;  %v1623_v4 = vmul.f32 %v2412_v42, %v2400_v30  ;;  %v1624_v47 = vmul.f32 %v2412_v42, %v2402_v32 }
 0x785   :  { %v1625_v34 = vmul.f32 %v2412_v42, %v2404_v9  ;;  %v1626_v39 = vmul.f32 %v2412_v42, %v2406_v3  ;;  %v1627_v33 = vmul.f32 %v2412_v42, %v2408_v37 }
 0x786   :  { %2308 = vmatprep.mubr.msk.f32.mxu1 %vm647_vm0, %v1621_v54 }
 0x787   :  { %2309 = vmatmul.mubr.msk.f32.vlgmr.msra.gmra.mxu1 %vm647_vm0, %v1622_v25 }
 0x788   :  { %2311 = vmatprep.mubr.msk.f32.mxu1 %vm647_vm0, %v1623_v4  ;;  %2321 = vmatpush3.msra.mxu1 %v3248_v15  ;;  %v1628_v15 = vmul.f32 %v2412_v42, %v2410_v62 }
 0x789   :  { %2322 = vmatprep.subr.mxu1 %v3610_v14 }
 0x78a   :  { %2323 = vmatpush3.msra.mxu1 %v3255_v43 }
 0x78b   :  { %2312 = vmatmul.mubr.msk.f32.gmra.mxu1 %vm647_vm0, %v1624_v47  ;;  %2324 = vmatprep.subr.mxu1 %v3610_v14 }
 0x78c   :  { %2314 = vmatprep.mubr.msk.f32.mxu1 %vm647_vm0, %v1625_v34  ;;  %2325 = vmatpush3.msra.mxu1 %v3264_v13 }
 0x78d   :  { %2326 = vmatprep.subr.mxu1 %v3610_v14 }
 0x78e   :  { %2327 = vmatpush3.msra.mxu1 %v3271_v50 }
 0x78f   :  { %2315 = vmatmul.mubr.msk.f32.gmra.mxu1 %vm647_vm0, %v1626_v39  ;;  %2328 = vmatprep.subr.mxu1 %v3610_v14 }
 0x790   :  { %2317 = vmatprep.mubr.msk.f32.mxu1 %vm647_vm0, %v1627_v33  ;;  %2329 = vmatpush3.msra.mxu1 %v3280_v16 }
 0x791   :  { %2330 = vmatprep.subr.mxu1 %v3610_v14 }
 0x792   :  { %2331 = vmatpush3.msra.mxu1 %v3287_v59 }
 0x793   :  { %2318 = vmatmul.mubr.msk.f32.gmra.mxu1 %vm647_vm0, %v1628_v15  ;;  %2332 = vmatprep.subr.mxu1 %v3610_v14 }
 0x794   :  { %2333 = vmatpush3.msra.mxu1 %v3295_v10  ;;  %2352 = vmatprep.mubr.msk.f32.mxu1 %vm2507_vm2, %v3610_v14 }
 0x795   :  { %2334 = vmatprep.subr.mxu1 %v3610_v14 }
 0x796   :  { %2335 = vmatpush3.msra.mxu1 %v3304_v49 }
 0x797   :  { %2336 = vmatprep.subr.mxu1 %v3610_v14 }
 0x798   :  { %2337 = vmatpush3.msra.mxu1 %v3311_v46 }
 0x799   :  { %2338 = vmatprep.subr.mxu1 %v3610_v14 }
 0x79a   :  { %2339 = vmatpush3.msra.mxu1 %v3318_v18 }
 0x79b   :  { %2340 = vmatprep.subr.mxu1 %v3610_v14 }
 0x79c   :  { %2341 = vmatpush3.msra.mxu1 %v3325_v52 }
 0x79d   :  { %2342 = vmatprep.subr.mxu1 %v3610_v14 }
 0x79e   :  { %2343 = vmatpush3.msra.mxu1 %v3332_v51 }
 0x79f   :  { %2344 = vmatprep.subr.mxu1 %v3610_v14 }
 0x7a0   :  { %2345 = vmatpush3.msra.mxu1 %v3339_v24 }
 0x7a1   :  { %2346 = vmatprep.subr.mxu1 %v3610_v14 }
 0x7a2   :  { %2347 = vmatpush3.msra.mxu1 %v3388_v44 }
 0x7a3   :  { %2348 = vmatprep.subr.mxu1 %v3610_v14 }
 0x7a4   :  { %2349 = vmatpush3.msra.mxu1 %v3395_v12 }
 0x7a5   :  { %2350 = vmatprep.subr.mxu1 %v3610_v14 }
 0x7a6   :  { %2351 = vmatpush3.msra.mxu1 %v3402_v8 }
 0x7a7   :  { %2355 = vmatprep.subr.mxu1 %v3610_v14 }
 0x847   :  { %v2310_v43 = vpop.f32.mrf.mxu1 }
 0x848   :  { %v1759_v59 = vmul.f32 %v2310_v43, %v3081_v61 }
 0x849   :  { %v1719_v13 = vpop.f32.mrf.mxu1 }
 0x84a   :  { %v1758_v50 = vmul.f32 %v1719_v13, %v3064_v5 }
 0x84b   :  { %v2313_v16 = vpop.f32.mrf.mxu1 }
 0x84c   :  { %v1766_v49 = vadd.f32 %v1759_v59, %v1758_v50  ;;  %v1761_v52 = vmul.f32 %v2313_v16, %v3109_v22 }
 0x84d   :  { %v1729_v10 = vpop.f32.mrf.mxu1 }
 0x84e   :  { %v1760_v46 = vmul.f32 %v1729_v10, %v3101_v31 }
 0x84f   :  { %v2316_v18 = vpop.f32.mrf.mxu1 }
 0x850   :  { %v1767_v51 = vadd.f32 %v1766_v49, %v1760_v46  ;;  %v1763_v35 = vmul.f32 %v2316_v18, %v3124_v23 }
 0x851   :  { %v1739_v24 = vpop.f32.mrf.mxu1 }
 0x852   :  { %v1762_v44 = vmul.f32 %v1739_v24, %v3116_v57  ;;  %v1768_v12 = vadd.f32 %v1767_v51, %v1761_v52 }
 0x853   :  { %v2319_v8 = vpop.f32.mrf.mxu1 }
 0x854   :  { %v1769_v55 = vadd.f32 %v1768_v12, %v1762_v44  ;;  %v1765_v17 = vmul.f32 %v2319_v8, %v3131_v38 }
 0x855   :  { %v1749_v5 = vpop.f32.mrf.mxu1 }
 0x856   :  { %v1764_v19 = vmul.f32 %v1749_v5, %v3133_v56  ;;  %v1770_v61 = vadd.f32 %v1769_v55, %v1763_v35 }
 0x858   :  { %v1771_v30 = vadd.f32 %v1770_v61, %v1764_v19 }
 0x85a   :  { %v1772_v31 = vadd.f32 %v1771_v30, %v1765_v17 }
 0x85c   :  { %v1773_v26 = vrot.slane %v1772_v31, 4 }
 0x85e   :  { %v1774_v32 = vadd.f32 %v1773_v26, %v1772_v31 }
 0x860   :  { %v1775_v22 = vrot.slane %v1774_v32, 2 }
 0x862   :  { %v1776_v63 = vadd.f32 %v1775_v22, %v1774_v32 }
 0x864   :  { %v1777_v48 = vrot.slane %v1776_v63, 1 }
 0x866   :  { %v1778_v9 = vadd.f32 %v1777_v48, %v1776_v63 }
 0x868   :  { %v1779_v57 = vmul.f32 %v1778_v9, %v1778_v9 }
 0x86a   :  { %2353 = vmatmul.mubr.f32.vlgmr.msra.gmra.mxu1 %v1779_v57 }
 0x86b   :  { %2356 = vmatpush3.msra.mxu1 %v3140_v36  ;;  %2357 = vmatprep.mubr.msk.f32.mxu1 %vm2507_vm2, %v3610_v14 }
 0x92a   :  { %v1846_v23 = vpop.f32.mrf.mxu1 }
 0x92b   :  { %2358 = vmatmul.mubr.msk.f32.vlgmr.msra.gmra.mxu1 %vm647_vm0, %v1846_v23 }
 0x92c   :  { %v2354_v56 = vpop.f32.mrf.mxu1 }
 0x9eb   :  { %v1919_v38 = vpop.f32.mrf.mxu1 }
 0x9ec   :  { %2413 = vrsqrt.f32 %v1919_v38  ;;  %v1931_v27 = vadd.f32 1.0, %v1919_v38  ;;  %vm1925_vm7 = vcmp.eq.f32.partialorder %v1919_v38, inf  ;;  %v1928_v53 = vand.u32 2147483648, %v1919_v38 }
 0x9ed   :  { %v2359_v41 = vpop.f32.mrf.mxu1  ;;  %vm1927_vm8 = vcmp.eq.f32.partialorder %v1919_v38, 0.0 }
 0x9ee   :  { %2415 = vrcp.f32 %v1931_v27 }
 0x9f9   :  { %v2414_v3 = vpop.eup %2413 }
 0x9fa   :  { %v1924_v40 = vmul.f32 %v2414_v3, %v1919_v38 }
 0x9fb   :  { %v2416_v14 = vpop.eup %2415 }
 0x9fc   :  { %v1926_v37 = vsel %vm1925_vm7, %v1919_v38, %v1924_v40 }
 0x9fd   :  { %v1929_v2 = vsel %vm1927_vm8, %v1928_v53, %v1926_v37 }
 0x9fe   :  { %v1930_v36 = vmul.f32 %v1929_v2, %v1778_v9 }
 0xa00   :  { %v1933_v20 = vmul.f32 %v2416_v14, %v1930_v36 }
 0xa02   :  { %1934 = vst [vmem:[#allocation7] sm:$0x1] %v1933_v20 }
 0xa03   :  { %2485 = shalt.err (!%p2482_p0)
}
 0xa04   :  { %1944 = dma.vmem_to_hbm [thread:$0]  %s1942_s10, 16, %s3501_s4, [#allocation4]  }
 0xa05   :  { %2498 = dma.done.wait [#allocation4], 16  }
 0xa06   :  { %2499 = vsyncadd [#allocation4], 4294967280 }
 0xa07   :  { %1948 = vsyncpa [#allocation3], 1 }
 0xa08   :  { %1949 = vsyncpa [#allocation6], 1 }
 0xa09   :  { %1950 = vsyncpa [#allocation4], 1 }

</bundles_post_ra>
